<compile_context>
chip_gen: v7x
topology: tpu7x:2x2x1
jax: 0.10.0
libtpu: 0.0.40
codegen_flags: <defaults>
</compile_context>

<pallas_src>
import jax
import jax.numpy as jnp
from jax.experimental import pallas as pl
from jax.experimental.pallas import tpu as pltpu


_LANES = 128
_CHUNK_ROWS = 64                      # (64, 128) f32 = 8 vregs per live array
_TILE_UNIT = _CHUNK_ROWS * _LANES     # 8192 elements; tiles are multiples of this
_TB_MAX = 32768                       # elements per grid step (review: sweep 8192-32768)


def featurenet_kernel(b_ref, u_ref, c_ref, x_ref, o_ref):
    # b_ref : SMEM (1,)  ExU bias (scalar)
    # u_ref : SMEM (H,)  per-hidden clamp point  u_j = exp(-w1_j)
    # c_ref : SMEM (H,)  per-hidden coefficient  c_j = w2_j * exp(w1_j)
    # x_ref : VMEM (R, 128) dense batch tile (batch laid out on sublanes x lanes)
    # o_ref : VMEM (R, 128)
    H = u_ref.shape[0]
    R = x_ref.shape[0]
    chunk = _CHUNK_ROWS if (R % _CHUNK_ROWS) == 0 else R
    b = b_ref[0]

    def hidden_sum(xc):
        acc = jnp.zeros_like(xc)
        if H <= 128:
            # Static unroll: pure VALU chain with scalar SMEM operands
            # (no MXU, no XLU, no broadcasts materialized).
            for j in range(H):
                acc = acc + c_ref[j] * jnp.minimum(xc, u_ref[j])
        else:
            def body(j, a):
                return a + c_ref[j] * jnp.minimum(xc, u_ref[j])
            acc = jax.lax.fori_loop(0, H, body, acc)
        return acc

    # Row-chunk loop keeps xc/acc (8 vregs each) register-resident across the
    # hidden loop instead of round-tripping a whole (R, 128) tile through VMEM.
    @pl.loop(0, R // chunk)
    def _(r):
        i = pl.multiple_of(r * chunk, chunk)
        xc = jnp.maximum(x_ref[pl.ds(i, chunk), :] - b, 0.0)   # hoisted ReLU(x - b)
        o_ref[pl.ds(i, chunk), :] = hidden_sum(xc)


def _round_up(a, m):
    return ((a + m - 1) // m) * m


def feature_net_forward(x, exu_bias, exu_weight, linear_weight, *, tb_max=_TB_MAX):
    """FeatureNet forward.

    x:             (N,)   the single input feature column
    exu_bias:      (1,)   ExU bias
    exu_weight:    (1, H) ExU weight (in, out) layout, pre-exp
    linear_weight: (1, H) nn.Linear(H, 1, bias=False).weight (out, in) layout
    returns        (N, 1) float32  - matches FeatureNet.forward
    """
    N = x.shape[0]
    H = exu_weight.shape[-1]

    # ---- batch tiling ------------------------------------------------------
    n_pad = _round_up(N, _TILE_UNIT)
    tb = min(_round_up(tb_max, _TILE_UNIT), n_pad)
    # Prefer >= 2 balanced grid steps when there is enough work so the
    # "parallel" axis can be sharded across both TensorCores on v7x.
    if tb == n_pad and n_pad >= 2 * _TILE_UNIT:
        tb = _round_up(n_pad // 2, _TILE_UNIT)
    g = pl.cdiv(n_pad, tb)
    n_pad = g * tb
    rows = n_pad // _LANES
    r_tile = tb // _LANES

    # ---- operand prep (all tiny / O(H)) ------------------------------------
    x = x.astype(jnp.float32)
    if n_pad != N:                      # pad only when needed; rows are independent
        x = jnp.pad(x, (0, n_pad - N))
    x2 = x.reshape(rows, _LANES)

    w1 = exu_weight.reshape(H).astype(jnp.float32)
    w2 = linear_weight.reshape(H).astype(jnp.float32)
    b = exu_bias.reshape(1).astype(jnp.float32)
    u = jnp.exp(-w1)                    # clamp point per hidden unit
    c = w2 * jnp.exp(w1)                # fused output coefficient

    cost = pl.CostEstimate(
        flops=(3 * H + 2) * n_pad,
        transcendentals=0,
        bytes_accessed=8 * n_pad + 4 * (2 * H + 1),
    )

    out = pl.pallas_call(
        featurenet_kernel,
        out_shape=jax.ShapeDtypeStruct((rows, _LANES), jnp.float32),
        grid_spec=pltpu.PrefetchScalarGridSpec(
            num_scalar_prefetch=0,
            grid=(g,),
            in_specs=[
                # Tiny per-hidden scalars live in SMEM (no VMEM tiles, no lane waste).
                pl.BlockSpec(memory_space=pltpu.MemorySpace.SMEM),   # b (1,)
                pl.BlockSpec(memory_space=pltpu.MemorySpace.SMEM),   # u (H,)
                pl.BlockSpec(memory_space=pltpu.MemorySpace.SMEM),   # c (H,)
                # Dense, lane- and sublane-full batch tile.
                pl.BlockSpec((r_tile, _LANES), lambda i: (i, 0)),
            ],
            out_specs=pl.BlockSpec((r_tile, _LANES), lambda i: (i, 0)),
        ),
        compiler_params=pltpu.CompilerParams(
            # Independent batch tiles -> shardable across TensorCores (v7x megacore).
            dimension_semantics=("parallel",),
        ),
        cost_estimate=cost,
    )(b, u, c, x2)

    y = out.reshape(n_pad, 1)
    return y if n_pad == N else y[:N]


def feature_net_reference(x, exu_bias, exu_weight, linear_weight):
    """Pure-JAX reference matching the PyTorch module exactly."""
    h = (x[:, None] - exu_bias[None, :]) @ jnp.exp(exu_weight)   # ExU
    h = jnp.clip(h, 0.0, 1.0)                                    # ReLUn(1)
    return h @ linear_weight.T                                   # Linear, no bias


if __name__ == "__main__":
    # One FeatureNet (in_size=1), hidden_profile=[32], out_size=1.
    # N is chosen so the kernel exercises padding AND a 2-step grid
    # (N=10000 -> pad to 16384 -> two 8192-element tiles).
    N = 10000
    H = 32

    key = jax.random.PRNGKey(0)
    kx, kw1, kb1, kw2 = jax.random.split(key, 4)

    x = jax.random.normal(kx, (N,), dtype=jnp.float32)

    # NAM-style ExU init: weight ~ N(4, 0.5), bias ~ N(0, 0.5).
    exu_weight = 4.0 + 0.5 * jax.random.normal(kw1, (1, H), dtype=jnp.float32)
    exu_bias = 0.5 * jax.random.normal(kb1, (1,), dtype=jnp.float32)
    # nn.Linear(H, 1, bias=False).weight has shape (1, H).
    linear_weight = jax.random.normal(kw2, (1, H), dtype=jnp.float32) / jnp.sqrt(H)

    out = feature_net_forward(x, exu_bias, exu_weight, linear_weight)
    out = jax.block_until_ready(out)

    ref = feature_net_reference(x, exu_bias, exu_weight, linear_weight)
    assert out.shape == (N, 1)
    max_err = float(jnp.max(jnp.abs(out - ref)))
    assert jnp.allclose(out, ref, atol=1e-4, rtol=1e-4), max_err

    print("KERNEL_OK")
</pallas_src>

<mosaic_0001>
module attributes {stable_mosaic.version = 11 : i64} {
  func.func @featurenet_kernel(%arg0: i32, %arg1: memref<1xf32, #tpu.memory_space<smem>>, %arg2: memref<32xf32, #tpu.memory_space<smem>>, %arg3: memref<32xf32, #tpu.memory_space<smem>>, %arg4: memref<64x128xf32, #tpu.memory_space<vmem>>, %arg5: memref<64x128xf32, #tpu.memory_space<vmem>>) attributes {dimension_semantics = [#tpu.dimension_semantics<parallel>], iteration_bounds = array<i64: 2>, scalar_prefetch = 0 : i64, scratch_operands = 0 : i64, tpu.core_type = #tpu.core_type<tc>, window_params = [{transform_indices = @transform_0, window_bounds = array<i64: 1>}, {transform_indices = @transform_1, window_bounds = array<i64: 32>}, {transform_indices = @transform_2, window_bounds = array<i64: 32>}, {transform_indices = @transform_3, window_bounds = array<i64: 64, 128>}, {transform_indices = @transform_4, window_bounds = array<i64: 64, 128>}]} {
    %c0 = arith.constant 0 : index
    %0 = memref.load %arg1[%c0] : memref<1xf32, #tpu.memory_space<smem>>
    %c0_i32 = arith.constant 0 : i32
    %c1_i32 = arith.constant 1 : i32
    %1 = arith.muli %c0_i32, %c1_i32 : i32
    %c0_i32_0 = arith.constant 0 : i32
    %2 = arith.addi %c0_i32_0, %1 : i32
    %c64_i32 = arith.constant 64 : i32
    %3 = arith.muli %2, %c64_i32 : i32
    %4 = tpu.assume_multiple %3, 64 : i32
    %5 = arith.index_cast %4 : i32 to index
    %c0_1 = arith.constant 0 : index
    %6 = vector.load %arg4[%5, %c0_1] : memref<64x128xf32, #tpu.memory_space<vmem>>, vector<64x128xf32>
    %7 = vector.broadcast %0 : f32 to vector<64x128xf32>
    %8 = arith.subf %6, %7 : vector<64x128xf32>
    %cst = arith.constant 0.000000e+00 : f32
    %9 = vector.broadcast %cst : f32 to vector<64x128xf32>
    %10 = arith.maximumf %8, %9 : vector<64x128xf32>
    %cst_2 = arith.constant 0.000000e+00 : f32
    %11 = vector.broadcast %cst_2 : f32 to vector<64x128xf32>
    %c0_3 = arith.constant 0 : index
    %12 = memref.load %arg3[%c0_3] : memref<32xf32, #tpu.memory_space<smem>>
    %c0_4 = arith.constant 0 : index
    %13 = memref.load %arg2[%c0_4] : memref<32xf32, #tpu.memory_space<smem>>
    %14 = vector.broadcast %13 : f32 to vector<64x128xf32>
    %15 = arith.minimumf %10, %14 : vector<64x128xf32>
    %16 = vector.broadcast %12 : f32 to vector<64x128xf32>
    %17 = arith.mulf %16, %15 : vector<64x128xf32>
    %18 = arith.addf %11, %17 : vector<64x128xf32>
    %c1 = arith.constant 1 : index
    %19 = memref.load %arg3[%c1] : memref<32xf32, #tpu.memory_space<smem>>
    %c1_5 = arith.constant 1 : index
    %20 = memref.load %arg2[%c1_5] : memref<32xf32, #tpu.memory_space<smem>>
    %21 = vector.broadcast %20 : f32 to vector<64x128xf32>
    %22 = arith.minimumf %10, %21 : vector<64x128xf32>
    %23 = vector.broadcast %19 : f32 to vector<64x128xf32>
    %24 = arith.mulf %23, %22 : vector<64x128xf32>
    %25 = arith.addf %18, %24 : vector<64x128xf32>
    %c2 = arith.constant 2 : index
    %26 = memref.load %arg3[%c2] : memref<32xf32, #tpu.memory_space<smem>>
    %c2_6 = arith.constant 2 : index
    %27 = memref.load %arg2[%c2_6] : memref<32xf32, #tpu.memory_space<smem>>
    %28 = vector.broadcast %27 : f32 to vector<64x128xf32>
    %29 = arith.minimumf %10, %28 : vector<64x128xf32>
    %30 = vector.broadcast %26 : f32 to vector<64x128xf32>
    %31 = arith.mulf %30, %29 : vector<64x128xf32>
    %32 = arith.addf %25, %31 : vector<64x128xf32>
    %c3 = arith.constant 3 : index
    %33 = memref.load %arg3[%c3] : memref<32xf32, #tpu.memory_space<smem>>
    %c3_7 = arith.constant 3 : index
    %34 = memref.load %arg2[%c3_7] : memref<32xf32, #tpu.memory_space<smem>>
    %35 = vector.broadcast %34 : f32 to vector<64x128xf32>
    %36 = arith.minimumf %10, %35 : vector<64x128xf32>
    %37 = vector.broadcast %33 : f32 to vector<64x128xf32>
    %38 = arith.mulf %37, %36 : vector<64x128xf32>
    %39 = arith.addf %32, %38 : vector<64x128xf32>
    %c4 = arith.constant 4 : index
    %40 = memref.load %arg3[%c4] : memref<32xf32, #tpu.memory_space<smem>>
    %c4_8 = arith.constant 4 : index
    %41 = memref.load %arg2[%c4_8] : memref<32xf32, #tpu.memory_space<smem>>
    %42 = vector.broadcast %41 : f32 to vector<64x128xf32>
    %43 = arith.minimumf %10, %42 : vector<64x128xf32>
    %44 = vector.broadcast %40 : f32 to vector<64x128xf32>
    %45 = arith.mulf %44, %43 : vector<64x128xf32>
    %46 = arith.addf %39, %45 : vector<64x128xf32>
    %c5 = arith.constant 5 : index
    %47 = memref.load %arg3[%c5] : memref<32xf32, #tpu.memory_space<smem>>
    %c5_9 = arith.constant 5 : index
    %48 = memref.load %arg2[%c5_9] : memref<32xf32, #tpu.memory_space<smem>>
    %49 = vector.broadcast %48 : f32 to vector<64x128xf32>
    %50 = arith.minimumf %10, %49 : vector<64x128xf32>
    %51 = vector.broadcast %47 : f32 to vector<64x128xf32>
    %52 = arith.mulf %51, %50 : vector<64x128xf32>
    %53 = arith.addf %46, %52 : vector<64x128xf32>
    %c6 = arith.constant 6 : index
    %54 = memref.load %arg3[%c6] : memref<32xf32, #tpu.memory_space<smem>>
    %c6_10 = arith.constant 6 : index
    %55 = memref.load %arg2[%c6_10] : memref<32xf32, #tpu.memory_space<smem>>
    %56 = vector.broadcast %55 : f32 to vector<64x128xf32>
    %57 = arith.minimumf %10, %56 : vector<64x128xf32>
    %58 = vector.broadcast %54 : f32 to vector<64x128xf32>
    %59 = arith.mulf %58, %57 : vector<64x128xf32>
    %60 = arith.addf %53, %59 : vector<64x128xf32>
    %c7 = arith.constant 7 : index
    %61 = memref.load %arg3[%c7] : memref<32xf32, #tpu.memory_space<smem>>
    %c7_11 = arith.constant 7 : index
    %62 = memref.load %arg2[%c7_11] : memref<32xf32, #tpu.memory_space<smem>>
    %63 = vector.broadcast %62 : f32 to vector<64x128xf32>
    %64 = arith.minimumf %10, %63 : vector<64x128xf32>
    %65 = vector.broadcast %61 : f32 to vector<64x128xf32>
    %66 = arith.mulf %65, %64 : vector<64x128xf32>
    %67 = arith.addf %60, %66 : vector<64x128xf32>
    %c8 = arith.constant 8 : index
    %68 = memref.load %arg3[%c8] : memref<32xf32, #tpu.memory_space<smem>>
    %c8_12 = arith.constant 8 : index
    %69 = memref.load %arg2[%c8_12] : memref<32xf32, #tpu.memory_space<smem>>
    %70 = vector.broadcast %69 : f32 to vector<64x128xf32>
    %71 = arith.minimumf %10, %70 : vector<64x128xf32>
    %72 = vector.broadcast %68 : f32 to vector<64x128xf32>
    %73 = arith.mulf %72, %71 : vector<64x128xf32>
    %74 = arith.addf %67, %73 : vector<64x128xf32>
    %c9 = arith.constant 9 : index
    %75 = memref.load %arg3[%c9] : memref<32xf32, #tpu.memory_space<smem>>
    %c9_13 = arith.constant 9 : index
    %76 = memref.load %arg2[%c9_13] : memref<32xf32, #tpu.memory_space<smem>>
    %77 = vector.broadcast %76 : f32 to vector<64x128xf32>
    %78 = arith.minimumf %10, %77 : vector<64x128xf32>
    %79 = vector.broadcast %75 : f32 to vector<64x128xf32>
    %80 = arith.mulf %79, %78 : vector<64x128xf32>
    %81 = arith.addf %74, %80 : vector<64x128xf32>
    %c10 = arith.constant 10 : index
    %82 = memref.load %arg3[%c10] : memref<32xf32, #tpu.memory_space<smem>>
    %c10_14 = arith.constant 10 : index
    %83 = memref.load %arg2[%c10_14] : memref<32xf32, #tpu.memory_space<smem>>
    %84 = vector.broadcast %83 : f32 to vector<64x128xf32>
    %85 = arith.minimumf %10, %84 : vector<64x128xf32>
    %86 = vector.broadcast %82 : f32 to vector<64x128xf32>
    %87 = arith.mulf %86, %85 : vector<64x128xf32>
    %88 = arith.addf %81, %87 : vector<64x128xf32>
    %c11 = arith.constant 11 : index
    %89 = memref.load %arg3[%c11] : memref<32xf32, #tpu.memory_space<smem>>
    %c11_15 = arith.constant 11 : index
    %90 = memref.load %arg2[%c11_15] : memref<32xf32, #tpu.memory_space<smem>>
    %91 = vector.broadcast %90 : f32 to vector<64x128xf32>
    %92 = arith.minimumf %10, %91 : vector<64x128xf32>
    %93 = vector.broadcast %89 : f32 to vector<64x128xf32>
    %94 = arith.mulf %93, %92 : vector<64x128xf32>
    %95 = arith.addf %88, %94 : vector<64x128xf32>
    %c12 = arith.constant 12 : index
    %96 = memref.load %arg3[%c12] : memref<32xf32, #tpu.memory_space<smem>>
    %c12_16 = arith.constant 12 : index
    %97 = memref.load %arg2[%c12_16] : memref<32xf32, #tpu.memory_space<smem>>
    %98 = vector.broadcast %97 : f32 to vector<64x128xf32>
    %99 = arith.minimumf %10, %98 : vector<64x128xf32>
    %100 = vector.broadcast %96 : f32 to vector<64x128xf32>
    %101 = arith.mulf %100, %99 : vector<64x128xf32>
    %102 = arith.addf %95, %101 : vector<64x128xf32>
    %c13 = arith.constant 13 : index
    %103 = memref.load %arg3[%c13] : memref<32xf32, #tpu.memory_space<smem>>
    %c13_17 = arith.constant 13 : index
    %104 = memref.load %arg2[%c13_17] : memref<32xf32, #tpu.memory_space<smem>>
    %105 = vector.broadcast %104 : f32 to vector<64x128xf32>
    %106 = arith.minimumf %10, %105 : vector<64x128xf32>
    %107 = vector.broadcast %103 : f32 to vector<64x128xf32>
    %108 = arith.mulf %107, %106 : vector<64x128xf32>
    %109 = arith.addf %102, %108 : vector<64x128xf32>
    %c14 = arith.constant 14 : index
    %110 = memref.load %arg3[%c14] : memref<32xf32, #tpu.memory_space<smem>>
    %c14_18 = arith.constant 14 : index
    %111 = memref.load %arg2[%c14_18] : memref<32xf32, #tpu.memory_space<smem>>
    %112 = vector.broadcast %111 : f32 to vector<64x128xf32>
    %113 = arith.minimumf %10, %112 : vector<64x128xf32>
    %114 = vector.broadcast %110 : f32 to vector<64x128xf32>
    %115 = arith.mulf %114, %113 : vector<64x128xf32>
    %116 = arith.addf %109, %115 : vector<64x128xf32>
    %c15 = arith.constant 15 : index
    %117 = memref.load %arg3[%c15] : memref<32xf32, #tpu.memory_space<smem>>
    %c15_19 = arith.constant 15 : index
    %118 = memref.load %arg2[%c15_19] : memref<32xf32, #tpu.memory_space<smem>>
    %119 = vector.broadcast %118 : f32 to vector<64x128xf32>
    %120 = arith.minimumf %10, %119 : vector<64x128xf32>
    %121 = vector.broadcast %117 : f32 to vector<64x128xf32>
    %122 = arith.mulf %121, %120 : vector<64x128xf32>
    %123 = arith.addf %116, %122 : vector<64x128xf32>
    %c16 = arith.constant 16 : index
    %124 = memref.load %arg3[%c16] : memref<32xf32, #tpu.memory_space<smem>>
    %c16_20 = arith.constant 16 : index
    %125 = memref.load %arg2[%c16_20] : memref<32xf32, #tpu.memory_space<smem>>
    %126 = vector.broadcast %125 : f32 to vector<64x128xf32>
    %127 = arith.minimumf %10, %126 : vector<64x128xf32>
    %128 = vector.broadcast %124 : f32 to vector<64x128xf32>
    %129 = arith.mulf %128, %127 : vector<64x128xf32>
    %130 = arith.addf %123, %129 : vector<64x128xf32>
    %c17 = arith.constant 17 : index
    %131 = memref.load %arg3[%c17] : memref<32xf32, #tpu.memory_space<smem>>
    %c17_21 = arith.constant 17 : index
    %132 = memref.load %arg2[%c17_21] : memref<32xf32, #tpu.memory_space<smem>>
    %133 = vector.broadcast %132 : f32 to vector<64x128xf32>
    %134 = arith.minimumf %10, %133 : vector<64x128xf32>
    %135 = vector.broadcast %131 : f32 to vector<64x128xf32>
    %136 = arith.mulf %135, %134 : vector<64x128xf32>
    %137 = arith.addf %130, %136 : vector<64x128xf32>
    %c18 = arith.constant 18 : index
    %138 = memref.load %arg3[%c18] : memref<32xf32, #tpu.memory_space<smem>>
    %c18_22 = arith.constant 18 : index
    %139 = memref.load %arg2[%c18_22] : memref<32xf32, #tpu.memory_space<smem>>
    %140 = vector.broadcast %139 : f32 to vector<64x128xf32>
    %141 = arith.minimumf %10, %140 : vector<64x128xf32>
    %142 = vector.broadcast %138 : f32 to vector<64x128xf32>
    %143 = arith.mulf %142, %141 : vector<64x128xf32>
    %144 = arith.addf %137, %143 : vector<64x128xf32>
    %c19 = arith.constant 19 : index
    %145 = memref.load %arg3[%c19] : memref<32xf32, #tpu.memory_space<smem>>
    %c19_23 = arith.constant 19 : index
    %146 = memref.load %arg2[%c19_23] : memref<32xf32, #tpu.memory_space<smem>>
    %147 = vector.broadcast %146 : f32 to vector<64x128xf32>
    %148 = arith.minimumf %10, %147 : vector<64x128xf32>
    %149 = vector.broadcast %145 : f32 to vector<64x128xf32>
    %150 = arith.mulf %149, %148 : vector<64x128xf32>
    %151 = arith.addf %144, %150 : vector<64x128xf32>
    %c20 = arith.constant 20 : index
    %152 = memref.load %arg3[%c20] : memref<32xf32, #tpu.memory_space<smem>>
    %c20_24 = arith.constant 20 : index
    %153 = memref.load %arg2[%c20_24] : memref<32xf32, #tpu.memory_space<smem>>
    %154 = vector.broadcast %153 : f32 to vector<64x128xf32>
    %155 = arith.minimumf %10, %154 : vector<64x128xf32>
    %156 = vector.broadcast %152 : f32 to vector<64x128xf32>
    %157 = arith.mulf %156, %155 : vector<64x128xf32>
    %158 = arith.addf %151, %157 : vector<64x128xf32>
    %c21 = arith.constant 21 : index
    %159 = memref.load %arg3[%c21] : memref<32xf32, #tpu.memory_space<smem>>
    %c21_25 = arith.constant 21 : index
    %160 = memref.load %arg2[%c21_25] : memref<32xf32, #tpu.memory_space<smem>>
    %161 = vector.broadcast %160 : f32 to vector<64x128xf32>
    %162 = arith.minimumf %10, %161 : vector<64x128xf32>
    %163 = vector.broadcast %159 : f32 to vector<64x128xf32>
    %164 = arith.mulf %163, %162 : vector<64x128xf32>
    %165 = arith.addf %158, %164 : vector<64x128xf32>
    %c22 = arith.constant 22 : index
    %166 = memref.load %arg3[%c22] : memref<32xf32, #tpu.memory_space<smem>>
    %c22_26 = arith.constant 22 : index
    %167 = memref.load %arg2[%c22_26] : memref<32xf32, #tpu.memory_space<smem>>
    %168 = vector.broadcast %167 : f32 to vector<64x128xf32>
    %169 = arith.minimumf %10, %168 : vector<64x128xf32>
    %170 = vector.broadcast %166 : f32 to vector<64x128xf32>
    %171 = arith.mulf %170, %169 : vector<64x128xf32>
    %172 = arith.addf %165, %171 : vector<64x128xf32>
    %c23 = arith.constant 23 : index
    %173 = memref.load %arg3[%c23] : memref<32xf32, #tpu.memory_space<smem>>
    %c23_27 = arith.constant 23 : index
    %174 = memref.load %arg2[%c23_27] : memref<32xf32, #tpu.memory_space<smem>>
    %175 = vector.broadcast %174 : f32 to vector<64x128xf32>
    %176 = arith.minimumf %10, %175 : vector<64x128xf32>
    %177 = vector.broadcast %173 : f32 to vector<64x128xf32>
    %178 = arith.mulf %177, %176 : vector<64x128xf32>
    %179 = arith.addf %172, %178 : vector<64x128xf32>
    %c24 = arith.constant 24 : index
    %180 = memref.load %arg3[%c24] : memref<32xf32, #tpu.memory_space<smem>>
    %c24_28 = arith.constant 24 : index
    %181 = memref.load %arg2[%c24_28] : memref<32xf32, #tpu.memory_space<smem>>
    %182 = vector.broadcast %181 : f32 to vector<64x128xf32>
    %183 = arith.minimumf %10, %182 : vector<64x128xf32>
    %184 = vector.broadcast %180 : f32 to vector<64x128xf32>
    %185 = arith.mulf %184, %183 : vector<64x128xf32>
    %186 = arith.addf %179, %185 : vector<64x128xf32>
    %c25 = arith.constant 25 : index
    %187 = memref.load %arg3[%c25] : memref<32xf32, #tpu.memory_space<smem>>
    %c25_29 = arith.constant 25 : index
    %188 = memref.load %arg2[%c25_29] : memref<32xf32, #tpu.memory_space<smem>>
    %189 = vector.broadcast %188 : f32 to vector<64x128xf32>
    %190 = arith.minimumf %10, %189 : vector<64x128xf32>
    %191 = vector.broadcast %187 : f32 to vector<64x128xf32>
    %192 = arith.mulf %191, %190 : vector<64x128xf32>
    %193 = arith.addf %186, %192 : vector<64x128xf32>
    %c26 = arith.constant 26 : index
    %194 = memref.load %arg3[%c26] : memref<32xf32, #tpu.memory_space<smem>>
    %c26_30 = arith.constant 26 : index
    %195 = memref.load %arg2[%c26_30] : memref<32xf32, #tpu.memory_space<smem>>
    %196 = vector.broadcast %195 : f32 to vector<64x128xf32>
    %197 = arith.minimumf %10, %196 : vector<64x128xf32>
    %198 = vector.broadcast %194 : f32 to vector<64x128xf32>
    %199 = arith.mulf %198, %197 : vector<64x128xf32>
    %200 = arith.addf %193, %199 : vector<64x128xf32>
    %c27 = arith.constant 27 : index
    %201 = memref.load %arg3[%c27] : memref<32xf32, #tpu.memory_space<smem>>
    %c27_31 = arith.constant 27 : index
    %202 = memref.load %arg2[%c27_31] : memref<32xf32, #tpu.memory_space<smem>>
    %203 = vector.broadcast %202 : f32 to vector<64x128xf32>
    %204 = arith.minimumf %10, %203 : vector<64x128xf32>
    %205 = vector.broadcast %201 : f32 to vector<64x128xf32>
    %206 = arith.mulf %205, %204 : vector<64x128xf32>
    %207 = arith.addf %200, %206 : vector<64x128xf32>
    %c28 = arith.constant 28 : index
    %208 = memref.load %arg3[%c28] : memref<32xf32, #tpu.memory_space<smem>>
    %c28_32 = arith.constant 28 : index
    %209 = memref.load %arg2[%c28_32] : memref<32xf32, #tpu.memory_space<smem>>
    %210 = vector.broadcast %209 : f32 to vector<64x128xf32>
    %211 = arith.minimumf %10, %210 : vector<64x128xf32>
    %212 = vector.broadcast %208 : f32 to vector<64x128xf32>
    %213 = arith.mulf %212, %211 : vector<64x128xf32>
    %214 = arith.addf %207, %213 : vector<64x128xf32>
    %c29 = arith.constant 29 : index
    %215 = memref.load %arg3[%c29] : memref<32xf32, #tpu.memory_space<smem>>
    %c29_33 = arith.constant 29 : index
    %216 = memref.load %arg2[%c29_33] : memref<32xf32, #tpu.memory_space<smem>>
    %217 = vector.broadcast %216 : f32 to vector<64x128xf32>
    %218 = arith.minimumf %10, %217 : vector<64x128xf32>
    %219 = vector.broadcast %215 : f32 to vector<64x128xf32>
    %220 = arith.mulf %219, %218 : vector<64x128xf32>
    %221 = arith.addf %214, %220 : vector<64x128xf32>
    %c30 = arith.constant 30 : index
    %222 = memref.load %arg3[%c30] : memref<32xf32, #tpu.memory_space<smem>>
    %c30_34 = arith.constant 30 : index
    %223 = memref.load %arg2[%c30_34] : memref<32xf32, #tpu.memory_space<smem>>
    %224 = vector.broadcast %223 : f32 to vector<64x128xf32>
    %225 = arith.minimumf %10, %224 : vector<64x128xf32>
    %226 = vector.broadcast %222 : f32 to vector<64x128xf32>
    %227 = arith.mulf %226, %225 : vector<64x128xf32>
    %228 = arith.addf %221, %227 : vector<64x128xf32>
    %c31 = arith.constant 31 : index
    %229 = memref.load %arg3[%c31] : memref<32xf32, #tpu.memory_space<smem>>
    %c31_35 = arith.constant 31 : index
    %230 = memref.load %arg2[%c31_35] : memref<32xf32, #tpu.memory_space<smem>>
    %231 = vector.broadcast %230 : f32 to vector<64x128xf32>
    %232 = arith.minimumf %10, %231 : vector<64x128xf32>
    %233 = vector.broadcast %229 : f32 to vector<64x128xf32>
    %234 = arith.mulf %233, %232 : vector<64x128xf32>
    %235 = arith.addf %228, %234 : vector<64x128xf32>
    %236 = arith.index_cast %4 : i32 to index
    %c0_36 = arith.constant 0 : index
    %237 = vector.load %arg5[%236, %c0_36] : memref<64x128xf32, #tpu.memory_space<vmem>>, vector<64x128xf32>
    tpu.vector_store %arg5[%236, %c0_36], %235 {strides = array<i32>} : memref<64x128xf32, #tpu.memory_space<vmem>>, vector<64x128xf32>,
    %c1_i32_37 = arith.constant 1 : i32
    return
  }
  func.func @transform_0(%arg0: i32) -> i32 {
    %c0_i32 = arith.constant 0 : i32
    %c0_i32_0 = arith.constant 0 : i32
    return %c0_i32 : i32
  }
  func.func @transform_1(%arg0: i32) -> i32 {
    %c0_i32 = arith.constant 0 : i32
    %c0_i32_0 = arith.constant 0 : i32
    return %c0_i32 : i32
  }
  func.func @transform_2(%arg0: i32) -> i32 {
    %c0_i32 = arith.constant 0 : i32
    %c0_i32_0 = arith.constant 0 : i32
    return %c0_i32 : i32
  }
  func.func @transform_3(%arg0: i32) -> (i32, i32) {
    %c0_i32 = arith.constant 0 : i32
    %c0_i32_0 = arith.constant 0 : i32
    return %arg0, %c0_i32 : i32, i32
  }
  func.func @transform_4(%arg0: i32) -> (i32, i32) {
    %c0_i32 = arith.constant 0 : i32
    %c0_i32_0 = arith.constant 0 : i32
    return %arg0, %c0_i32 : i32, i32
  }
}

</mosaic_0001>

<bundles_post_ra>
// kernel: tpu_custom_call.1
= control target key start
LH: loop header
LB: loop body
LE: loop exit
PB: predicated region body
PF: predicated region fallthrough
CT: control target
= control target key end

     0   :  { %s2273_s0 = inlined_call_operand.<no memory space> [shape: f32[1], index: 0, kind: input, shape index: {}]   ;;  %s2274_s1 = inlined_call_operand.vmem [shape: f32[32], index: 1, kind: input, shape index: {}]   ;;  %s2275_s2 = inlined_call_operand.vmem [shape: f32[32], index: 2, kind: input, shape index: {}]   ;;  %s2276_s3 = inlined_call_operand.hbm [shape: f32[128,128], index: 3, kind: input, shape index: {}]   ;;  %s2277_s4 = inlined_call_operand.hbm [shape: f32[128,128], index: 4, kind: output, shape index: {}]  }
   0x1   :  { %9 = sst [smem:[#allocation2]] %s2273_s0 }
   0x2   :  { %10 = vsyncpa [#allocation6], 0 }
   0x3   :  { %11 = vsyncpa [#allocation8], 0 }
   0x4   :  { %12 = vsyncpa [#allocation4], 0 }
   0x5   :  { %14 = vsyncpa [#allocation4 + $0x1], 0 }
   0x6   :  { %15 = vsyncpa [#allocation5], 0 }
   0x7   :  { %17 = vsyncpa [#allocation5 + $0x1], 0  ;;  %s1610_s17 = smov 0   ;;  %s1612_s18 = smov 0  }
   0x8   :  { %s1614_s19 = smov 0   ;;  %s1616_s20 = smov 0  }
   0x9 LB: > { %s1631_s0 = sadd.s32 4294967295, %s1572_s20   ;;  %s1285_s21 = sadd.s32 4294967294, %s1572_s20   ;;  %s1572_s20 = sphi %s1616_s20, %s2303_s20   ;;  %s1568_s19 = sphi %s1614_s19, %s2302_s19   ;;  %s1564_s18 = sphi %s1612_s18, %s2301_s18   ;;  %s1560_s17 = sphi %s1610_s17, %s2300_s17  }
   0xa   : > { %s1635_s22 = sadd.s32 1, %s1572_s20   ;;  %s93_s23 = sadd.s32 1, %s1568_s19 }
   0xb   : > { %s90_s24 = ssub.s32 %s1572_s20, %s1635_s22  ;;  %p100_p0 = scmp.ne.s32.totalorder %s1568_s19, %s1564_s18 }
   0xc   : > { %p91_p1 = scmp.eq.s32.totalorder %s90_s24, 0  ;;  %p101_p2 = scmp.eq.s32.totalorder %s1572_s20, 0 }
   0xd   : > { %p106_p3 = scmp.ne.s32.totalorder %s1564_s18, %s1560_s17  ;;  %p2278_p4 = scmp.eq.s32.totalorder %s1631_s0, 0 }
   0xe   : > { %s1647_s25 = scalar_select %p91_p1, %s1568_s19, %s93_s23  }
   0xf   : > { %p1649_p5 = por %p101_p2, %p100_p0  ;;  %p1655_p6 = por %p2278_p4, %p106_p3 }
  0x10   : > { %p130_p7 = scmp.eq.s32.totalorder %s1631_s0, 1  ;;  %p136_p8 = scmp.eq.s32.totalorder %s1285_s21, 1 }
  0x11   : > { %s2284_s27 = scalar_select %p1655_p6, 1, 0 }
  0x12   : > { %p1286_p9 = scmp.ge.s32.totalorder %s1572_s20, 1  ;;  %p143_p10 = scmp.lt.s32.totalorder %s1572_s20, 3 }
  0x13   : > { %p1662_p11 = por %p130_p7, %p100_p0  ;;  %p1666_p12 = por %p136_p8, %p106_p3 }
  0x14   : > { %p1670_p13 = pnand %p1286_p9, %p143_p10  ;;  %s159_s7 = sshll.u32 %s2274_s1, 4  ;;  %s160_s7 = int_to_ptr.vmem [resolvable:$true] %s159_s7 }
  0x15   : > { %s2285_s28 = scalar_select %p1662_p11, 1, 0 }
  0x16   : > { %s2286_s29 = scalar_select %p1666_p12, 1, 0 }
  0x17   : > { %s2287_s30 = scalar_select %p1670_p13, 1, 0 }
  0x18   : > { %p1379_p1 = pneg %p1670_p13  ;;  %p1396_p2 = scmp.lt.s32.totalorder %s1572_s20, 2 }
  0x19   : > { %s170_s11 = sshll.u32 %s2275_s2, 4  ;;  %s1438_s13 = scalar_lea.vmem %s160_s7, 16  ;;  %s171_s11 = int_to_ptr.vmem [resolvable:$true] %s170_s11 }
  0x1a   : > { %p1683_p7 = pnand %p1379_p1, %p2278_p4  ;;  %p1692_p3 = pnand %p1396_p2, %p1649_p5 }
  0x1b   : > { %p1439_p8 = scmp.ne.s32.totalorder %s160_s7, %s1438_s13  ;;  %p1446_p0 = scmp.lt.s32.totalorder %s160_s7, %s160_s7 }
  0x1c   : > { %s2289_s12 = scalar_select %p1692_p3, 1, 0 }
  0x1d   : > { %p1440_p9 = pneg %p1683_p7  ;;  %p1447_p4 = scmp.lt.s32.totalorder %s1438_s13, %s1438_s13 }
  0x1f   : > { %p1441_p10 = pnand %p1440_p9, %p1439_p8  ;;  %p1448_p12 = por %p1447_p4, %p1446_p0 }
  0x21   : > { %p1442_p1 = pneg %p1441_p10 }
  0x23   : > { %p1449_p11 = pnand %p1448_p12, %p1442_p1 }
  0x25   : > { %1452 = shalt.err (!%p1449_p11)
}
  0x26   : > { %s1574_s14 = smov [#allocation3]   ;;  %s181_s15 = sand.u32 1, %s1568_s19  }
  0x27   : > { %1382 = dma.vmem_to_smem (!%p1683_p7), %s160_s7, 16, %s1574_s14, [#allocation6]  }
  0x28   : > { %s1453_s16 = scalar_lea.vmem %s171_s11, 16  ;;  %p1461_p8 = scmp.lt.s32.totalorder %s171_s11, %s171_s11 }
  0x29   : > { %p1454_p5 = scmp.ne.s32.totalorder %s171_s11, %s1453_s16  ;;  %p1462_p10 = scmp.lt.s32.totalorder %s1453_s16, %s1453_s16 }
  0x2b   : > { %p1456_p2 = pnand %p1454_p5, %p1440_p9  ;;  %p1463_p13 = por %p1462_p10, %p1461_p8 }
  0x2d   : > { %p1457_p6 = pneg %p1456_p2 }
  0x2f   : > { %p1464_p3 = pnand %p1463_p13, %p1457_p6 }
  0x31   : > { %1467 = shalt.err (!%p1464_p3)
}
  0x32   : > { %s1575_s21 = smov [#allocation7]   ;;  %s1290_s23 = sshll.u32 %s181_s15, 6 }
  0x33   : > { %1385 = dma.vmem_to_smem (!%p1683_p7), %s171_s11, 16, %s1575_s21, [#allocation8]  }
  0x34   : > { %s1365_s24 = sshll.u32 %s1572_s20, 10  ;;  %s185_s7 = scalar_lea.vmem [#allocation9], %s1290_s23 }
  0x35   : > { %s1713_s6 = scalar_lea.hbm %s2276_s3, %s1365_s24  ;;  %s192_s9 = sshll.u32 %s185_s7, 4  ;;  %s1715_s9 = int_to_ptr.vmem [resolvable:$true] %s192_s9 }
  0x36   : > { %s1717_s8 = scalar_lea.sflag [#allocation4], %s181_s15  ;;  %s1468_s10 = scalar_lea.hbm %s1713_s6, 1024 }
  0x37   : > { %p1469_p4 = scmp.ne.s32.totalorder %s1713_s6, %s1468_s10  ;;  %p2290_p6 = scmp.ne.s32.totalorder %s2289_s12, 0 }
  0x38   : > { %s1473_s14 = scalar_lea.hbm %s2276_s3, 2048  ;;  %p1474_p0 = scmp.lt.u32.totalorder %s1713_s6, %s2276_s3 }
  0x39   : > { %p1470_p11 = pneg %p2290_p6  ;;  %p1475_p7 = scmp.lt.u32.totalorder %s1473_s14, %s1468_s10 }
  0x3a   : > { %p1477_p9 = scmp.lt.u32.totalorder %s1468_s10, %s1713_s6 }
  0x3b   : > { %p1471_p12 = pnand %p1470_p11, %p1469_p4  ;;  %p1476_p3 = por %p1475_p7, %p1474_p0 }
  0x3d   : > { %p1472_p13 = pneg %p1471_p12  ;;  %p1478_p1 = por %p1477_p9, %p1476_p3 }
  0x3f   : > { %p1479_p5 = pnand %p1478_p1, %p1472_p13 }
  0x41   : > { %1482 = shalt.err (!%p1479_p5)
}
  0x42   : > { %s1483_s15 = scalar_lea.vmem %s1715_s9, 1024  ;;  %s1576_s23 = smov [#allocation9]  }
  0x43   : > { %p1484_p2 = scmp.ne.s32.totalorder %s1715_s9, %s1483_s15  ;;  %s1488_s24 = sshll.u32 %s1576_s23, 4  ;;  %s1489_s24 = int_to_ptr.vmem [resolvable:$false] %s1488_s24 }
  0x44   : > { %s1490_s26 = scalar_lea.vmem %s1489_s24, 2048  ;;  %p1491_p4 = scmp.lt.s32.totalorder %s1715_s9, %s1489_s24 }
  0x45   : > { %p1486_p8 = pnand %p1484_p2, %p1470_p11  ;;  %p1492_p12 = scmp.lt.s32.totalorder %s1490_s26, %s1483_s15 }
  0x47   : > { %p1487_p10 = pneg %p1486_p8  ;;  %p1493_p0 = por %p1492_p12, %p1491_p4 }
  0x49   : > { %p1494_p7 = pnand %p1493_p0, %p1487_p10 }
  0x4b   : > { %1497 = shalt.err (!%p1494_p7)
}
  0x4c   : > { %s1577_s5 = smov 128   ;;  %s1578_s7 = smov 8  }
  0x4d   : > { %1389 = dma.hbm_to_vmem [thread:$0]  (!%p2290_p6), %s1713_s6, 1024, %s1715_s9, %s1717_s8, %s1577_s5, %s1577_s5, %s1578_s7  }
  0x4e   : > { %p2291_p11 = scmp.ne.s32.totalorder %s2287_s30, 0 }
  0x4f   : > { %p2292_p13 = scmp.eq.s32.totalorder (!%p2291_p11), %s1631_s0, 0 }
  0x50   : > { %204 = sbr.rel (%p2291_p11) target bundleno = 333 (0x14d), region = 36 }
  0x57   : > { %1543 = dma.done.wait (%p2292_p13), [#allocation6], 16   ;;  %p2293_p3 = pmov %p2292_p13 }
  0x59   : > { %1545 = vsyncadd (%p2293_p3), [#allocation6], 4294967280  ;;  %p2294_p9 = pmov %p2293_p3 }
  0x5a   : > { %p2295_p1 = pmov %p2293_p3 }
  0x5b   : > { %1547 = dma.done.wait (%p2294_p9), [#allocation8], 16  }
  0x5c   : > { %1549 = vsyncadd (%p2295_p1), [#allocation8], 4294967280  ;;  %s1756_s10 = sand.u32 1, %s1564_s18   ;;  %p2296_p6 = scmp.ne.s32.totalorder %s2284_s27, 0 }
  0x5d   : > { %s1296_s30 = sshll.u32 %s1756_s10, 6  ;;  %s215_s12 = scalar_lea.sflag [#allocation4], %s1756_s10 }
  0x5e   : > { %s218_s6 = scalar_lea.vmem [#allocation9], %s1296_s30 }
  0x5f   : > { %1551 = dma.done.wait (%p2296_p6), %s215_s12, 1024  }
  0x60   : > { %1553 = vsyncadd (%p2296_p6), %s215_s12, 4294966272 }
  0x61   : > { %223 = sfence }
  0x62   : > { %s246_s9 = sld [smem:[#allocation2]]  ;;  %v247_v0 = vld [vmem:[%s218_s6] sm:$0xff]  ;;  %v248_v1 = vld [vmem:[%s218_s6 + $0x8] sm:$0xff]  ;;  %s1298_s13 = sld [smem:[#allocation7 + $0x1]]  ;;  %v249_v2 = vld [vmem:[%s218_s6 + $0x10] sm:$0xff] }
  0x63   : > { %s1766_s8 = sld [smem:[#allocation7]]  ;;  %s1299_s14 = sld [smem:[#allocation3 + $0x1]]  ;;  %v250_v3 = vld [vmem:[%s218_s6 + $0x18] sm:$0xff]  ;;  %v251_v4 = vld [vmem:[%s218_s6 + $0x20] sm:$0xff]  ;;  %v252_v5 = vld [vmem:[%s218_s6 + $0x28] sm:$0xff] }
  0x64   : > { %s273_s11 = sld [smem:[#allocation3]]  ;;  %v253_v6 = vld [vmem:[%s218_s6 + $0x30] sm:$0xff]  ;;  %v254_v7 = vld [vmem:[%s218_s6 + $0x38] sm:$0xff]  ;;  %s1793_s27 = sld [smem:[#allocation7 + $0x2]] }
  0x65   : > { %s1795_s16 = sld [smem:[#allocation3 + $0x2]]  ;;  %s1797_s21 = sld [smem:[#allocation7 + $0x3]] }
  0x66   : > { %s1799_s15 = sld [smem:[#allocation3 + $0x3]]  ;;  %s1821_s23 = sld [smem:[#allocation7 + $0x4]] }
  0x67   : > { %s1823_s24 = sld [smem:[#allocation3 + $0x4]]  ;;  %s1825_s26 = sld [smem:[#allocation7 + $0x5]] }
  0x68   : > { %v255_v8 = vstv %s246_s9  ;;  %v311_v28 = vstv %s1298_s13  ;;  %s1827_s5 = sld [smem:[#allocation3 + $0x5]]  ;;  %s1849_s7 = sld [smem:[#allocation7 + $0x6]] }
  0x69   : > { %v256_v9 = vsub.f32 %v247_v0, %v255_v8  ;;  %v257_v10 = vsub.f32 %v248_v1, %v255_v8  ;;  %v258_v11 = vsub.f32 %v249_v2, %v255_v8  ;;  %v259_v12 = vsub.f32 %v250_v3, %v255_v8  ;;  %s1851_s12 = sld [smem:[#allocation3 + $0x6]]  ;;  %s1853_s6 = sld [smem:[#allocation7 + $0x7]] }
  0x6a   : > { %v260_v13 = vsub.f32 %v251_v4, %v255_v8  ;;  %v261_v14 = vsub.f32 %v252_v5, %v255_v8  ;;  %v262_v15 = vsub.f32 %v253_v6, %v255_v8  ;;  %v263_v16 = vsub.f32 %v254_v7, %v255_v8  ;;  %s1855_s9 = sld [smem:[#allocation3 + $0x7]]  ;;  %s1881_s13 = sld [smem:[#allocation7 + $0x9]] }
  0x6b   : > { %v1768_v17 = vmax.f32 %v256_v9, 0.0  ;;  %v1770_v18 = vmax.f32 %v257_v10, 0.0  ;;  %v1772_v19 = vmax.f32 %v258_v11, 0.0  ;;  %v1774_v20 = vmax.f32 %v259_v12, 0.0  ;;  %p2297_p2 = scmp.ne.s32.totalorder %s2285_s28, 0 }
  0x6c   : > { %v1776_v21 = vmax.f32 %v260_v13, 0.0  ;;  %v1778_v22 = vmax.f32 %v261_v14, 0.0  ;;  %v1780_v23 = vmax.f32 %v262_v15, 0.0  ;;  %v1782_v24 = vmax.f32 %v263_v16, 0.0 }
  0x6d   : > { %v274_v25 = vstv %s273_s11  ;;  %v283_v26 = vstv %s1766_s8  ;;  %v302_v27 = vstv %s1299_s14  ;;  %v330_v5 = vstv %s1795_s16  ;;  %s1877_s8 = sld [smem:[#allocation7 + $0x8]]  ;;  %s1883_s14 = sld [smem:[#allocation3 + $0x9]] }
  0x6e   : > { %v275_v29 = vmin.f32 %v1768_v17, %v274_v25  ;;  %v276_v30 = vmin.f32 %v1770_v18, %v274_v25  ;;  %v277_v31 = vmin.f32 %v1772_v19, %v274_v25  ;;  %v278_v32 = vmin.f32 %v1774_v20, %v274_v25  ;;  %s1879_s11 = sld [smem:[#allocation3 + $0x8]]  ;;  %s1907_s16 = sld [smem:[#allocation3 + $0xa]] }
  0x6f   : > { %v279_v33 = vmin.f32 %v1776_v21, %v274_v25  ;;  %v280_v34 = vmin.f32 %v1778_v22, %v274_v25  ;;  %v281_v35 = vmin.f32 %v1780_v23, %v274_v25  ;;  %v282_v36 = vmin.f32 %v1782_v24, %v274_v25 }
  0x70   : > { %v284_v37 = vmul.f32 %v283_v26, %v275_v29  ;;  %v285_v38 = vmul.f32 %v283_v26, %v276_v30  ;;  %v286_v39 = vmul.f32 %v283_v26, %v277_v31  ;;  %v287_v40 = vmul.f32 %v283_v26, %v278_v32 }
  0x71   : > { %v288_v41 = vmul.f32 %v283_v26, %v279_v33  ;;  %v289_v42 = vmul.f32 %v283_v26, %v280_v34  ;;  %v290_v43 = vmul.f32 %v283_v26, %v281_v35  ;;  %v291_v44 = vmul.f32 %v283_v26, %v282_v36 }
  0x72   : > { %v303_v45 = vmin.f32 %v1768_v17, %v302_v27  ;;  %v304_v46 = vmin.f32 %v1770_v18, %v302_v27  ;;  %v305_v47 = vmin.f32 %v1772_v19, %v302_v27  ;;  %v306_v48 = vmin.f32 %v1774_v20, %v302_v27 }
  0x73   : > { %v307_v49 = vmin.f32 %v1776_v21, %v302_v27  ;;  %v308_v50 = vmin.f32 %v1778_v22, %v302_v27  ;;  %v309_v51 = vmin.f32 %v1780_v23, %v302_v27  ;;  %v310_v52 = vmin.f32 %v1782_v24, %v302_v27 }
  0x74   : > { %v312_v53 = vmul.f32 %v311_v28, %v303_v45  ;;  %v313_v54 = vmul.f32 %v311_v28, %v304_v46  ;;  %v314_v55 = vmul.f32 %v311_v28, %v305_v47  ;;  %v315_v56 = vmul.f32 %v311_v28, %v306_v48 }
  0x75   : > { %v316_v57 = vmul.f32 %v311_v28, %v307_v49  ;;  %v317_v58 = vmul.f32 %v311_v28, %v308_v50  ;;  %v318_v59 = vmul.f32 %v311_v28, %v309_v51  ;;  %v319_v60 = vmul.f32 %v311_v28, %v310_v52 }
  0x76   : > { %v320_v61 = vadd.f32 %v312_v53, %v284_v37  ;;  %v321_v62 = vadd.f32 %v313_v54, %v285_v38  ;;  %v322_v63 = vadd.f32 %v314_v55, %v286_v39  ;;  %v323_v0 = vadd.f32 %v315_v56, %v287_v40 }
  0x77   : > { %v324_v1 = vadd.f32 %v316_v57, %v288_v41  ;;  %v325_v2 = vadd.f32 %v317_v58, %v289_v42  ;;  %v326_v3 = vadd.f32 %v318_v59, %v290_v43  ;;  %v327_v4 = vadd.f32 %v319_v60, %v291_v44 }
  0x78   : > { %v339_v6 = vstv %s1793_s27  ;;  %v358_v7 = vstv %s1799_s15  ;;  %v367_v8 = vstv %s1797_s21  ;;  %v331_v9 = vmin.f32 %v1768_v17, %v330_v5  ;;  %s1905_s27 = sld [smem:[#allocation7 + $0xa]]  ;;  %s1909_s21 = sld [smem:[#allocation7 + $0xb]] }
  0x79   : > { %v332_v10 = vmin.f32 %v1770_v18, %v330_v5  ;;  %v333_v11 = vmin.f32 %v1772_v19, %v330_v5  ;;  %v334_v12 = vmin.f32 %v1774_v20, %v330_v5  ;;  %v335_v13 = vmin.f32 %v1776_v21, %v330_v5  ;;  %s1911_s15 = sld [smem:[#allocation3 + $0xb]] }
  0x7a   : > { %v336_v14 = vmin.f32 %v1778_v22, %v330_v5  ;;  %v337_v15 = vmin.f32 %v1780_v23, %v330_v5  ;;  %v338_v16 = vmin.f32 %v1782_v24, %v330_v5  ;;  %v340_v25 = vmul.f32 %v339_v6, %v331_v9 }
  0x7b   : > { %v341_v26 = vmul.f32 %v339_v6, %v332_v10  ;;  %v342_v27 = vmul.f32 %v339_v6, %v333_v11  ;;  %v343_v28 = vmul.f32 %v339_v6, %v334_v12  ;;  %v344_v29 = vmul.f32 %v339_v6, %v335_v13 }
  0x7c   : > { %v345_v30 = vmul.f32 %v339_v6, %v336_v14  ;;  %v346_v31 = vmul.f32 %v339_v6, %v337_v15  ;;  %v347_v32 = vmul.f32 %v339_v6, %v338_v16  ;;  %v348_v33 = vadd.f32 %v340_v25, %v320_v61 }
  0x7d   : > { %v349_v34 = vadd.f32 %v341_v26, %v321_v62  ;;  %v350_v35 = vadd.f32 %v342_v27, %v322_v63  ;;  %v351_v36 = vadd.f32 %v343_v28, %v323_v0  ;;  %v352_v37 = vadd.f32 %v344_v29, %v324_v1 }
  0x7e   : > { %v353_v38 = vadd.f32 %v345_v30, %v325_v2  ;;  %v354_v39 = vadd.f32 %v346_v31, %v326_v3  ;;  %v355_v40 = vadd.f32 %v347_v32, %v327_v4  ;;  %v359_v41 = vmin.f32 %v1768_v17, %v358_v7 }
  0x7f   : > { %v360_v42 = vmin.f32 %v1770_v18, %v358_v7  ;;  %v361_v43 = vmin.f32 %v1772_v19, %v358_v7  ;;  %v362_v44 = vmin.f32 %v1774_v20, %v358_v7  ;;  %v363_v45 = vmin.f32 %v1776_v21, %v358_v7 }
  0x80   : > { %v364_v46 = vmin.f32 %v1778_v22, %v358_v7  ;;  %v365_v47 = vmin.f32 %v1780_v23, %v358_v7  ;;  %v366_v48 = vmin.f32 %v1782_v24, %v358_v7  ;;  %v368_v49 = vmul.f32 %v367_v8, %v359_v41 }
  0x81   : > { %v369_v50 = vmul.f32 %v367_v8, %v360_v42  ;;  %v370_v51 = vmul.f32 %v367_v8, %v361_v43  ;;  %v371_v52 = vmul.f32 %v367_v8, %v362_v44  ;;  %v372_v53 = vmul.f32 %v367_v8, %v363_v45 }
  0x82   : > { %v373_v54 = vmul.f32 %v367_v8, %v364_v46  ;;  %v374_v55 = vmul.f32 %v367_v8, %v365_v47  ;;  %v375_v56 = vmul.f32 %v367_v8, %v366_v48  ;;  %v376_v57 = vadd.f32 %v368_v49, %v348_v33 }
  0x83   : > { %v377_v58 = vadd.f32 %v369_v50, %v349_v34  ;;  %v378_v59 = vadd.f32 %v370_v51, %v350_v35  ;;  %v379_v60 = vadd.f32 %v371_v52, %v351_v36  ;;  %v380_v61 = vadd.f32 %v372_v53, %v352_v37 }
  0x84   : > { %v381_v62 = vadd.f32 %v373_v54, %v353_v38  ;;  %v382_v63 = vadd.f32 %v374_v55, %v354_v39  ;;  %v383_v0 = vadd.f32 %v375_v56, %v355_v40  ;;  %v386_v1 = vstv %s1823_s24  ;;  %s1935_s24 = sld [smem:[#allocation3 + $0xc]] }
  0x85   : > { %v395_v2 = vstv %s1821_s23  ;;  %v414_v3 = vstv %s1827_s5  ;;  %v423_v4 = vstv %s1825_s26  ;;  %v387_v5 = vmin.f32 %v1768_v17, %v386_v1  ;;  %s1933_s23 = sld [smem:[#allocation7 + $0xc]]  ;;  %s1937_s26 = sld [smem:[#allocation7 + $0xd]] }
  0x86   : > { %v388_v6 = vmin.f32 %v1770_v18, %v386_v1  ;;  %v389_v7 = vmin.f32 %v1772_v19, %v386_v1  ;;  %v390_v8 = vmin.f32 %v1774_v20, %v386_v1  ;;  %v391_v9 = vmin.f32 %v1776_v21, %v386_v1  ;;  %s1939_s5 = sld [smem:[#allocation3 + $0xd]] }
  0x87   : > { %v392_v10 = vmin.f32 %v1778_v22, %v386_v1  ;;  %v393_v11 = vmin.f32 %v1780_v23, %v386_v1  ;;  %v394_v12 = vmin.f32 %v1782_v24, %v386_v1  ;;  %v396_v13 = vmul.f32 %v395_v2, %v387_v5 }
  0x88   : > { %v397_v14 = vmul.f32 %v395_v2, %v388_v6  ;;  %v398_v15 = vmul.f32 %v395_v2, %v389_v7  ;;  %v399_v16 = vmul.f32 %v395_v2, %v390_v8  ;;  %v400_v25 = vmul.f32 %v395_v2, %v391_v9 }
  0x89   : > { %v401_v26 = vmul.f32 %v395_v2, %v392_v10  ;;  %v402_v27 = vmul.f32 %v395_v2, %v393_v11  ;;  %v403_v28 = vmul.f32 %v395_v2, %v394_v12  ;;  %v404_v29 = vadd.f32 %v396_v13, %v376_v57 }
  0x8a   : > { %v405_v30 = vadd.f32 %v397_v14, %v377_v58  ;;  %v406_v31 = vadd.f32 %v398_v15, %v378_v59  ;;  %v407_v32 = vadd.f32 %v399_v16, %v379_v60  ;;  %v408_v33 = vadd.f32 %v400_v25, %v380_v61 }
  0x8b   : > { %v409_v34 = vadd.f32 %v401_v26, %v381_v62  ;;  %v410_v35 = vadd.f32 %v402_v27, %v382_v63  ;;  %v411_v36 = vadd.f32 %v403_v28, %v383_v0  ;;  %v415_v37 = vmin.f32 %v1768_v17, %v414_v3 }
  0x8c   : > { %v416_v38 = vmin.f32 %v1770_v18, %v414_v3  ;;  %v417_v39 = vmin.f32 %v1772_v19, %v414_v3  ;;  %v418_v40 = vmin.f32 %v1774_v20, %v414_v3  ;;  %v419_v41 = vmin.f32 %v1776_v21, %v414_v3 }
  0x8d   : > { %v420_v42 = vmin.f32 %v1778_v22, %v414_v3  ;;  %v421_v43 = vmin.f32 %v1780_v23, %v414_v3  ;;  %v422_v44 = vmin.f32 %v1782_v24, %v414_v3  ;;  %v424_v45 = vmul.f32 %v423_v4, %v415_v37 }
  0x8e   : > { %v425_v46 = vmul.f32 %v423_v4, %v416_v38  ;;  %v426_v47 = vmul.f32 %v423_v4, %v417_v39  ;;  %v427_v48 = vmul.f32 %v423_v4, %v418_v40  ;;  %v428_v49 = vmul.f32 %v423_v4, %v419_v41 }
  0x8f   : > { %v429_v50 = vmul.f32 %v423_v4, %v420_v42  ;;  %v430_v51 = vmul.f32 %v423_v4, %v421_v43  ;;  %v431_v52 = vmul.f32 %v423_v4, %v422_v44  ;;  %v432_v53 = vadd.f32 %v424_v45, %v404_v29 }
  0x90   : > { %v433_v54 = vadd.f32 %v425_v46, %v405_v30  ;;  %v434_v55 = vadd.f32 %v426_v47, %v406_v31  ;;  %v435_v56 = vadd.f32 %v427_v48, %v407_v32  ;;  %v436_v57 = vadd.f32 %v428_v49, %v408_v33 }
  0x91   : > { %v437_v58 = vadd.f32 %v429_v50, %v409_v34  ;;  %v438_v59 = vadd.f32 %v430_v51, %v410_v35  ;;  %v439_v60 = vadd.f32 %v431_v52, %v411_v36  ;;  %v442_v61 = vstv %s1851_s12  ;;  %s1963_s12 = sld [smem:[#allocation3 + $0xe]] }
  0x92   : > { %v451_v62 = vstv %s1849_s7  ;;  %v470_v63 = vstv %s1855_s9  ;;  %v479_v0 = vstv %s1853_s6  ;;  %v443_v1 = vmin.f32 %v1768_v17, %v442_v61  ;;  %s1961_s7 = sld [smem:[#allocation7 + $0xe]]  ;;  %s1965_s6 = sld [smem:[#allocation7 + $0xf]] }
  0x93   : > { %v444_v2 = vmin.f32 %v1770_v18, %v442_v61  ;;  %v445_v3 = vmin.f32 %v1772_v19, %v442_v61  ;;  %v446_v4 = vmin.f32 %v1774_v20, %v442_v61  ;;  %v447_v5 = vmin.f32 %v1776_v21, %v442_v61  ;;  %s1967_s9 = sld [smem:[#allocation3 + $0xf]] }
  0x94   : > { %v448_v6 = vmin.f32 %v1778_v22, %v442_v61  ;;  %v449_v7 = vmin.f32 %v1780_v23, %v442_v61  ;;  %v450_v8 = vmin.f32 %v1782_v24, %v442_v61  ;;  %v452_v9 = vmul.f32 %v451_v62, %v443_v1 }
  0x95   : > { %v453_v10 = vmul.f32 %v451_v62, %v444_v2  ;;  %v454_v11 = vmul.f32 %v451_v62, %v445_v3  ;;  %v455_v12 = vmul.f32 %v451_v62, %v446_v4  ;;  %v456_v13 = vmul.f32 %v451_v62, %v447_v5 }
  0x96   : > { %v457_v14 = vmul.f32 %v451_v62, %v448_v6  ;;  %v458_v15 = vmul.f32 %v451_v62, %v449_v7  ;;  %v459_v16 = vmul.f32 %v451_v62, %v450_v8  ;;  %v460_v25 = vadd.f32 %v452_v9, %v432_v53 }
  0x97   : > { %v461_v26 = vadd.f32 %v453_v10, %v433_v54  ;;  %v462_v27 = vadd.f32 %v454_v11, %v434_v55  ;;  %v463_v28 = vadd.f32 %v455_v12, %v435_v56  ;;  %v464_v29 = vadd.f32 %v456_v13, %v436_v57 }
  0x98   : > { %v465_v30 = vadd.f32 %v457_v14, %v437_v58  ;;  %v466_v31 = vadd.f32 %v458_v15, %v438_v59  ;;  %v467_v32 = vadd.f32 %v459_v16, %v439_v60  ;;  %v471_v33 = vmin.f32 %v1768_v17, %v470_v63 }
  0x99   : > { %v472_v34 = vmin.f32 %v1770_v18, %v470_v63  ;;  %v473_v35 = vmin.f32 %v1772_v19, %v470_v63  ;;  %v474_v36 = vmin.f32 %v1774_v20, %v470_v63  ;;  %v475_v37 = vmin.f32 %v1776_v21, %v470_v63 }
  0x9a   : > { %v476_v38 = vmin.f32 %v1778_v22, %v470_v63  ;;  %v477_v39 = vmin.f32 %v1780_v23, %v470_v63  ;;  %v478_v40 = vmin.f32 %v1782_v24, %v470_v63  ;;  %v480_v41 = vmul.f32 %v479_v0, %v471_v33 }
  0x9b   : > { %v481_v42 = vmul.f32 %v479_v0, %v472_v34  ;;  %v482_v43 = vmul.f32 %v479_v0, %v473_v35  ;;  %v483_v44 = vmul.f32 %v479_v0, %v474_v36  ;;  %v484_v45 = vmul.f32 %v479_v0, %v475_v37 }
  0x9c   : > { %v485_v46 = vmul.f32 %v479_v0, %v476_v38  ;;  %v486_v47 = vmul.f32 %v479_v0, %v477_v39  ;;  %v487_v48 = vmul.f32 %v479_v0, %v478_v40  ;;  %v488_v49 = vadd.f32 %v480_v41, %v460_v25 }
  0x9d   : > { %v489_v50 = vadd.f32 %v481_v42, %v461_v26  ;;  %v490_v51 = vadd.f32 %v482_v43, %v462_v27  ;;  %v491_v52 = vadd.f32 %v483_v44, %v463_v28  ;;  %v492_v53 = vadd.f32 %v484_v45, %v464_v29 }
  0x9e   : > { %v493_v54 = vadd.f32 %v485_v46, %v465_v30  ;;  %v494_v55 = vadd.f32 %v486_v47, %v466_v31  ;;  %v495_v56 = vadd.f32 %v487_v48, %v467_v32  ;;  %v498_v57 = vstv %s1879_s11  ;;  %s1991_s11 = sld [smem:[#allocation3 + $0x10]] }
  0x9f   : > { %v507_v58 = vstv %s1877_s8  ;;  %v526_v59 = vstv %s1883_s14  ;;  %v535_v60 = vstv %s1881_s13  ;;  %v499_v61 = vmin.f32 %v1768_v17, %v498_v57  ;;  %s1989_s8 = sld [smem:[#allocation7 + $0x10]]  ;;  %s1993_s13 = sld [smem:[#allocation7 + $0x11]] }
  0xa0   : > { %v500_v62 = vmin.f32 %v1770_v18, %v498_v57  ;;  %v501_v63 = vmin.f32 %v1772_v19, %v498_v57  ;;  %v502_v0 = vmin.f32 %v1774_v20, %v498_v57  ;;  %v503_v1 = vmin.f32 %v1776_v21, %v498_v57  ;;  %s1995_s14 = sld [smem:[#allocation3 + $0x11]] }
  0xa1   : > { %v504_v2 = vmin.f32 %v1778_v22, %v498_v57  ;;  %v505_v3 = vmin.f32 %v1780_v23, %v498_v57  ;;  %v506_v4 = vmin.f32 %v1782_v24, %v498_v57  ;;  %v508_v5 = vmul.f32 %v507_v58, %v499_v61 }
  0xa2   : > { %v509_v6 = vmul.f32 %v507_v58, %v500_v62  ;;  %v510_v7 = vmul.f32 %v507_v58, %v501_v63  ;;  %v511_v8 = vmul.f32 %v507_v58, %v502_v0  ;;  %v512_v9 = vmul.f32 %v507_v58, %v503_v1 }
  0xa3   : > { %v513_v10 = vmul.f32 %v507_v58, %v504_v2  ;;  %v514_v11 = vmul.f32 %v507_v58, %v505_v3  ;;  %v515_v12 = vmul.f32 %v507_v58, %v506_v4  ;;  %v516_v13 = vadd.f32 %v508_v5, %v488_v49 }
  0xa4   : > { %v517_v14 = vadd.f32 %v509_v6, %v489_v50  ;;  %v518_v15 = vadd.f32 %v510_v7, %v490_v51  ;;  %v519_v16 = vadd.f32 %v511_v8, %v491_v52  ;;  %v520_v25 = vadd.f32 %v512_v9, %v492_v53 }
  0xa5   : > { %v521_v26 = vadd.f32 %v513_v10, %v493_v54  ;;  %v522_v27 = vadd.f32 %v514_v11, %v494_v55  ;;  %v523_v28 = vadd.f32 %v515_v12, %v495_v56  ;;  %v527_v29 = vmin.f32 %v1768_v17, %v526_v59 }
  0xa6   : > { %v528_v30 = vmin.f32 %v1770_v18, %v526_v59  ;;  %v529_v31 = vmin.f32 %v1772_v19, %v526_v59  ;;  %v530_v32 = vmin.f32 %v1774_v20, %v526_v59  ;;  %v531_v33 = vmin.f32 %v1776_v21, %v526_v59 }
  0xa7   : > { %v532_v34 = vmin.f32 %v1778_v22, %v526_v59  ;;  %v533_v35 = vmin.f32 %v1780_v23, %v526_v59  ;;  %v534_v36 = vmin.f32 %v1782_v24, %v526_v59  ;;  %v536_v37 = vmul.f32 %v535_v60, %v527_v29 }
  0xa8   : > { %v537_v38 = vmul.f32 %v535_v60, %v528_v30  ;;  %v538_v39 = vmul.f32 %v535_v60, %v529_v31  ;;  %v539_v40 = vmul.f32 %v535_v60, %v530_v32  ;;  %v540_v41 = vmul.f32 %v535_v60, %v531_v33 }
  0xa9   : > { %v541_v42 = vmul.f32 %v535_v60, %v532_v34  ;;  %v542_v43 = vmul.f32 %v535_v60, %v533_v35  ;;  %v543_v44 = vmul.f32 %v535_v60, %v534_v36  ;;  %v544_v45 = vadd.f32 %v536_v37, %v516_v13 }
  0xaa   : > { %v545_v46 = vadd.f32 %v537_v38, %v517_v14  ;;  %v546_v47 = vadd.f32 %v538_v39, %v518_v15  ;;  %v547_v48 = vadd.f32 %v539_v40, %v519_v16  ;;  %v548_v49 = vadd.f32 %v540_v41, %v520_v25 }
  0xab   : > { %v549_v50 = vadd.f32 %v541_v42, %v521_v26  ;;  %v550_v51 = vadd.f32 %v542_v43, %v522_v27  ;;  %v551_v52 = vadd.f32 %v543_v44, %v523_v28  ;;  %v554_v53 = vstv %s1907_s16  ;;  %s2019_s16 = sld [smem:[#allocation3 + $0x12]] }
  0xac   : > { %v563_v54 = vstv %s1905_s27  ;;  %v582_v55 = vstv %s1911_s15  ;;  %v591_v56 = vstv %s1909_s21  ;;  %v555_v57 = vmin.f32 %v1768_v17, %v554_v53  ;;  %s2017_s27 = sld [smem:[#allocation7 + $0x12]]  ;;  %s2021_s21 = sld [smem:[#allocation7 + $0x13]] }
  0xad   : > { %v556_v58 = vmin.f32 %v1770_v18, %v554_v53  ;;  %v557_v59 = vmin.f32 %v1772_v19, %v554_v53  ;;  %v558_v60 = vmin.f32 %v1774_v20, %v554_v53  ;;  %v559_v61 = vmin.f32 %v1776_v21, %v554_v53  ;;  %s2023_s15 = sld [smem:[#allocation3 + $0x13]] }
  0xae   : > { %v560_v62 = vmin.f32 %v1778_v22, %v554_v53  ;;  %v561_v63 = vmin.f32 %v1780_v23, %v554_v53  ;;  %v562_v0 = vmin.f32 %v1782_v24, %v554_v53  ;;  %v564_v1 = vmul.f32 %v563_v54, %v555_v57 }
  0xaf   : > { %v565_v2 = vmul.f32 %v563_v54, %v556_v58  ;;  %v566_v3 = vmul.f32 %v563_v54, %v557_v59  ;;  %v567_v4 = vmul.f32 %v563_v54, %v558_v60  ;;  %v568_v5 = vmul.f32 %v563_v54, %v559_v61 }
  0xb0   : > { %v569_v6 = vmul.f32 %v563_v54, %v560_v62  ;;  %v570_v7 = vmul.f32 %v563_v54, %v561_v63  ;;  %v571_v8 = vmul.f32 %v563_v54, %v562_v0  ;;  %v572_v9 = vadd.f32 %v564_v1, %v544_v45 }
  0xb1   : > { %v573_v10 = vadd.f32 %v565_v2, %v545_v46  ;;  %v574_v11 = vadd.f32 %v566_v3, %v546_v47  ;;  %v575_v12 = vadd.f32 %v567_v4, %v547_v48  ;;  %v576_v13 = vadd.f32 %v568_v5, %v548_v49 }
  0xb2   : > { %v577_v14 = vadd.f32 %v569_v6, %v549_v50  ;;  %v578_v15 = vadd.f32 %v570_v7, %v550_v51  ;;  %v579_v16 = vadd.f32 %v571_v8, %v551_v52  ;;  %v583_v25 = vmin.f32 %v1768_v17, %v582_v55 }
  0xb3   : > { %v584_v26 = vmin.f32 %v1770_v18, %v582_v55  ;;  %v585_v27 = vmin.f32 %v1772_v19, %v582_v55  ;;  %v586_v28 = vmin.f32 %v1774_v20, %v582_v55  ;;  %v587_v29 = vmin.f32 %v1776_v21, %v582_v55 }
  0xb4   : > { %v588_v30 = vmin.f32 %v1778_v22, %v582_v55  ;;  %v589_v31 = vmin.f32 %v1780_v23, %v582_v55  ;;  %v590_v32 = vmin.f32 %v1782_v24, %v582_v55  ;;  %v592_v33 = vmul.f32 %v591_v56, %v583_v25 }
  0xb5   : > { %v593_v34 = vmul.f32 %v591_v56, %v584_v26  ;;  %v594_v35 = vmul.f32 %v591_v56, %v585_v27  ;;  %v595_v36 = vmul.f32 %v591_v56, %v586_v28  ;;  %v596_v37 = vmul.f32 %v591_v56, %v587_v29 }
  0xb6   : > { %v597_v38 = vmul.f32 %v591_v56, %v588_v30  ;;  %v598_v39 = vmul.f32 %v591_v56, %v589_v31  ;;  %v599_v40 = vmul.f32 %v591_v56, %v590_v32  ;;  %v600_v41 = vadd.f32 %v592_v33, %v572_v9 }
  0xb7   : > { %v601_v42 = vadd.f32 %v593_v34, %v573_v10  ;;  %v602_v43 = vadd.f32 %v594_v35, %v574_v11  ;;  %v603_v44 = vadd.f32 %v595_v36, %v575_v12  ;;  %v604_v45 = vadd.f32 %v596_v37, %v576_v13 }
  0xb8   : > { %v605_v46 = vadd.f32 %v597_v38, %v577_v14  ;;  %v606_v47 = vadd.f32 %v598_v39, %v578_v15  ;;  %v607_v48 = vadd.f32 %v599_v40, %v579_v16  ;;  %v610_v49 = vstv %s1935_s24  ;;  %s2047_s24 = sld [smem:[#allocation3 + $0x14]] }
  0xb9   : > { %v619_v50 = vstv %s1933_s23  ;;  %v638_v51 = vstv %s1939_s5  ;;  %v647_v52 = vstv %s1937_s26  ;;  %v611_v53 = vmin.f32 %v1768_v17, %v610_v49  ;;  %s2045_s23 = sld [smem:[#allocation7 + $0x14]]  ;;  %s2049_s26 = sld [smem:[#allocation7 + $0x15]] }
  0xba   : > { %v612_v54 = vmin.f32 %v1770_v18, %v610_v49  ;;  %v613_v55 = vmin.f32 %v1772_v19, %v610_v49  ;;  %v614_v56 = vmin.f32 %v1774_v20, %v610_v49  ;;  %v615_v57 = vmin.f32 %v1776_v21, %v610_v49  ;;  %s2051_s5 = sld [smem:[#allocation3 + $0x15]] }
  0xbb   : > { %v616_v58 = vmin.f32 %v1778_v22, %v610_v49  ;;  %v617_v59 = vmin.f32 %v1780_v23, %v610_v49  ;;  %v618_v60 = vmin.f32 %v1782_v24, %v610_v49  ;;  %v620_v61 = vmul.f32 %v619_v50, %v611_v53 }
  0xbc   : > { %v621_v62 = vmul.f32 %v619_v50, %v612_v54  ;;  %v622_v63 = vmul.f32 %v619_v50, %v613_v55  ;;  %v623_v0 = vmul.f32 %v619_v50, %v614_v56  ;;  %v624_v1 = vmul.f32 %v619_v50, %v615_v57 }
  0xbd   : > { %v625_v2 = vmul.f32 %v619_v50, %v616_v58  ;;  %v626_v3 = vmul.f32 %v619_v50, %v617_v59  ;;  %v627_v4 = vmul.f32 %v619_v50, %v618_v60  ;;  %v628_v5 = vadd.f32 %v620_v61, %v600_v41 }
  0xbe   : > { %v629_v6 = vadd.f32 %v621_v62, %v601_v42  ;;  %v630_v7 = vadd.f32 %v622_v63, %v602_v43  ;;  %v631_v8 = vadd.f32 %v623_v0, %v603_v44  ;;  %v632_v9 = vadd.f32 %v624_v1, %v604_v45 }
  0xbf   : > { %v633_v10 = vadd.f32 %v625_v2, %v605_v46  ;;  %v634_v11 = vadd.f32 %v626_v3, %v606_v47  ;;  %v635_v12 = vadd.f32 %v627_v4, %v607_v48  ;;  %v639_v13 = vmin.f32 %v1768_v17, %v638_v51 }
  0xc0   : > { %v640_v14 = vmin.f32 %v1770_v18, %v638_v51  ;;  %v641_v15 = vmin.f32 %v1772_v19, %v638_v51  ;;  %v642_v16 = vmin.f32 %v1774_v20, %v638_v51  ;;  %v643_v25 = vmin.f32 %v1776_v21, %v638_v51 }
  0xc1   : > { %v644_v26 = vmin.f32 %v1778_v22, %v638_v51  ;;  %v645_v27 = vmin.f32 %v1780_v23, %v638_v51  ;;  %v646_v28 = vmin.f32 %v1782_v24, %v638_v51  ;;  %v648_v29 = vmul.f32 %v647_v52, %v639_v13 }
  0xc2   : > { %v649_v30 = vmul.f32 %v647_v52, %v640_v14  ;;  %v650_v31 = vmul.f32 %v647_v52, %v641_v15  ;;  %v651_v32 = vmul.f32 %v647_v52, %v642_v16  ;;  %v652_v33 = vmul.f32 %v647_v52, %v643_v25 }
  0xc3   : > { %v653_v34 = vmul.f32 %v647_v52, %v644_v26  ;;  %v654_v35 = vmul.f32 %v647_v52, %v645_v27  ;;  %v655_v36 = vmul.f32 %v647_v52, %v646_v28  ;;  %v656_v37 = vadd.f32 %v648_v29, %v628_v5 }
  0xc4   : > { %v657_v38 = vadd.f32 %v649_v30, %v629_v6  ;;  %v658_v39 = vadd.f32 %v650_v31, %v630_v7  ;;  %v659_v40 = vadd.f32 %v651_v32, %v631_v8  ;;  %v660_v41 = vadd.f32 %v652_v33, %v632_v9 }
  0xc5   : > { %v661_v42 = vadd.f32 %v653_v34, %v633_v10  ;;  %v662_v43 = vadd.f32 %v654_v35, %v634_v11  ;;  %v663_v44 = vadd.f32 %v655_v36, %v635_v12  ;;  %v666_v45 = vstv %s1963_s12  ;;  %s2075_s12 = sld [smem:[#allocation3 + $0x16]] }
  0xc6   : > { %v675_v46 = vstv %s1961_s7  ;;  %v694_v47 = vstv %s1967_s9  ;;  %v703_v48 = vstv %s1965_s6  ;;  %v667_v49 = vmin.f32 %v1768_v17, %v666_v45  ;;  %s2073_s7 = sld [smem:[#allocation7 + $0x16]]  ;;  %s2077_s6 = sld [smem:[#allocation7 + $0x17]] }
  0xc7   : > { %v668_v50 = vmin.f32 %v1770_v18, %v666_v45  ;;  %v669_v51 = vmin.f32 %v1772_v19, %v666_v45  ;;  %v670_v52 = vmin.f32 %v1774_v20, %v666_v45  ;;  %v671_v53 = vmin.f32 %v1776_v21, %v666_v45  ;;  %s2079_s9 = sld [smem:[#allocation3 + $0x17]] }
  0xc8   : > { %v672_v54 = vmin.f32 %v1778_v22, %v666_v45  ;;  %v673_v55 = vmin.f32 %v1780_v23, %v666_v45  ;;  %v674_v56 = vmin.f32 %v1782_v24, %v666_v45  ;;  %v676_v57 = vmul.f32 %v675_v46, %v667_v49 }
  0xc9   : > { %v677_v58 = vmul.f32 %v675_v46, %v668_v50  ;;  %v678_v59 = vmul.f32 %v675_v46, %v669_v51  ;;  %v679_v60 = vmul.f32 %v675_v46, %v670_v52  ;;  %v680_v61 = vmul.f32 %v675_v46, %v671_v53 }
  0xca   : > { %v681_v62 = vmul.f32 %v675_v46, %v672_v54  ;;  %v682_v63 = vmul.f32 %v675_v46, %v673_v55  ;;  %v683_v0 = vmul.f32 %v675_v46, %v674_v56  ;;  %v684_v1 = vadd.f32 %v676_v57, %v656_v37 }
  0xcb   : > { %v685_v2 = vadd.f32 %v677_v58, %v657_v38  ;;  %v686_v3 = vadd.f32 %v678_v59, %v658_v39  ;;  %v687_v4 = vadd.f32 %v679_v60, %v659_v40  ;;  %v688_v5 = vadd.f32 %v680_v61, %v660_v41 }
  0xcc   : > { %v689_v6 = vadd.f32 %v681_v62, %v661_v42  ;;  %v690_v7 = vadd.f32 %v682_v63, %v662_v43  ;;  %v691_v8 = vadd.f32 %v683_v0, %v663_v44  ;;  %v695_v9 = vmin.f32 %v1768_v17, %v694_v47 }
  0xcd   : > { %v696_v10 = vmin.f32 %v1770_v18, %v694_v47  ;;  %v697_v11 = vmin.f32 %v1772_v19, %v694_v47  ;;  %v698_v12 = vmin.f32 %v1774_v20, %v694_v47  ;;  %v699_v13 = vmin.f32 %v1776_v21, %v694_v47 }
  0xce   : > { %v700_v14 = vmin.f32 %v1778_v22, %v694_v47  ;;  %v701_v15 = vmin.f32 %v1780_v23, %v694_v47  ;;  %v702_v16 = vmin.f32 %v1782_v24, %v694_v47  ;;  %v704_v25 = vmul.f32 %v703_v48, %v695_v9 }
  0xcf   : > { %v705_v26 = vmul.f32 %v703_v48, %v696_v10  ;;  %v706_v27 = vmul.f32 %v703_v48, %v697_v11  ;;  %v707_v28 = vmul.f32 %v703_v48, %v698_v12  ;;  %v708_v29 = vmul.f32 %v703_v48, %v699_v13 }
  0xd0   : > { %v709_v30 = vmul.f32 %v703_v48, %v700_v14  ;;  %v710_v31 = vmul.f32 %v703_v48, %v701_v15  ;;  %v711_v32 = vmul.f32 %v703_v48, %v702_v16  ;;  %v712_v33 = vadd.f32 %v704_v25, %v684_v1 }
  0xd1   : > { %v713_v34 = vadd.f32 %v705_v26, %v685_v2  ;;  %v714_v35 = vadd.f32 %v706_v27, %v686_v3  ;;  %v715_v36 = vadd.f32 %v707_v28, %v687_v4  ;;  %v716_v37 = vadd.f32 %v708_v29, %v688_v5 }
  0xd2   : > { %v717_v38 = vadd.f32 %v709_v30, %v689_v6  ;;  %v718_v39 = vadd.f32 %v710_v31, %v690_v7  ;;  %v719_v40 = vadd.f32 %v711_v32, %v691_v8  ;;  %v722_v41 = vstv %s1991_s11  ;;  %s2103_s11 = sld [smem:[#allocation3 + $0x18]] }
  0xd3   : > { %v731_v42 = vstv %s1989_s8  ;;  %v750_v43 = vstv %s1995_s14  ;;  %v759_v44 = vstv %s1993_s13  ;;  %v723_v45 = vmin.f32 %v1768_v17, %v722_v41  ;;  %s2101_s8 = sld [smem:[#allocation7 + $0x18]]  ;;  %s2105_s13 = sld [smem:[#allocation7 + $0x19]] }
  0xd4   : > { %v724_v46 = vmin.f32 %v1770_v18, %v722_v41  ;;  %v725_v47 = vmin.f32 %v1772_v19, %v722_v41  ;;  %v726_v48 = vmin.f32 %v1774_v20, %v722_v41  ;;  %v727_v49 = vmin.f32 %v1776_v21, %v722_v41  ;;  %s2107_s14 = sld [smem:[#allocation3 + $0x19]] }
  0xd5   : > { %v728_v50 = vmin.f32 %v1778_v22, %v722_v41  ;;  %v729_v51 = vmin.f32 %v1780_v23, %v722_v41  ;;  %v730_v52 = vmin.f32 %v1782_v24, %v722_v41  ;;  %v732_v53 = vmul.f32 %v731_v42, %v723_v45 }
  0xd6   : > { %v733_v54 = vmul.f32 %v731_v42, %v724_v46  ;;  %v734_v55 = vmul.f32 %v731_v42, %v725_v47  ;;  %v735_v56 = vmul.f32 %v731_v42, %v726_v48  ;;  %v736_v57 = vmul.f32 %v731_v42, %v727_v49 }
  0xd7   : > { %v737_v58 = vmul.f32 %v731_v42, %v728_v50  ;;  %v738_v59 = vmul.f32 %v731_v42, %v729_v51  ;;  %v739_v60 = vmul.f32 %v731_v42, %v730_v52  ;;  %v740_v61 = vadd.f32 %v732_v53, %v712_v33 }
  0xd8   : > { %v741_v62 = vadd.f32 %v733_v54, %v713_v34  ;;  %v742_v63 = vadd.f32 %v734_v55, %v714_v35  ;;  %v743_v0 = vadd.f32 %v735_v56, %v715_v36  ;;  %v744_v1 = vadd.f32 %v736_v57, %v716_v37 }
  0xd9   : > { %v745_v2 = vadd.f32 %v737_v58, %v717_v38  ;;  %v746_v3 = vadd.f32 %v738_v59, %v718_v39  ;;  %v747_v4 = vadd.f32 %v739_v60, %v719_v40  ;;  %v751_v5 = vmin.f32 %v1768_v17, %v750_v43 }
  0xda   : > { %v752_v6 = vmin.f32 %v1770_v18, %v750_v43  ;;  %v753_v7 = vmin.f32 %v1772_v19, %v750_v43  ;;  %v754_v8 = vmin.f32 %v1774_v20, %v750_v43  ;;  %v755_v9 = vmin.f32 %v1776_v21, %v750_v43 }
  0xdb   : > { %v756_v10 = vmin.f32 %v1778_v22, %v750_v43  ;;  %v757_v11 = vmin.f32 %v1780_v23, %v750_v43  ;;  %v758_v12 = vmin.f32 %v1782_v24, %v750_v43  ;;  %v760_v13 = vmul.f32 %v759_v44, %v751_v5 }
  0xdc   : > { %v761_v14 = vmul.f32 %v759_v44, %v752_v6  ;;  %v762_v15 = vmul.f32 %v759_v44, %v753_v7  ;;  %v763_v16 = vmul.f32 %v759_v44, %v754_v8  ;;  %v764_v25 = vmul.f32 %v759_v44, %v755_v9 }
  0xdd   : > { %v765_v26 = vmul.f32 %v759_v44, %v756_v10  ;;  %v766_v27 = vmul.f32 %v759_v44, %v757_v11  ;;  %v767_v28 = vmul.f32 %v759_v44, %v758_v12  ;;  %v768_v29 = vadd.f32 %v760_v13, %v740_v61 }
  0xde   : > { %v769_v30 = vadd.f32 %v761_v14, %v741_v62  ;;  %v770_v31 = vadd.f32 %v762_v15, %v742_v63  ;;  %v771_v32 = vadd.f32 %v763_v16, %v743_v0  ;;  %v772_v33 = vadd.f32 %v764_v25, %v744_v1 }
  0xdf   : > { %v773_v34 = vadd.f32 %v765_v26, %v745_v2  ;;  %v774_v35 = vadd.f32 %v766_v27, %v746_v3  ;;  %v775_v36 = vadd.f32 %v767_v28, %v747_v4  ;;  %v778_v37 = vstv %s2019_s16  ;;  %s2131_s16 = sld [smem:[#allocation3 + $0x1a]] }
  0xe0   : > { %v787_v38 = vstv %s2017_s27  ;;  %v806_v39 = vstv %s2023_s15  ;;  %v815_v40 = vstv %s2021_s21  ;;  %v779_v41 = vmin.f32 %v1768_v17, %v778_v37  ;;  %s2129_s27 = sld [smem:[#allocation7 + $0x1a]]  ;;  %s2133_s21 = sld [smem:[#allocation7 + $0x1b]] }
  0xe1   : > { %v780_v42 = vmin.f32 %v1770_v18, %v778_v37  ;;  %v781_v43 = vmin.f32 %v1772_v19, %v778_v37  ;;  %v782_v44 = vmin.f32 %v1774_v20, %v778_v37  ;;  %v783_v45 = vmin.f32 %v1776_v21, %v778_v37  ;;  %s2135_s15 = sld [smem:[#allocation3 + $0x1b]] }
  0xe2   : > { %v784_v46 = vmin.f32 %v1778_v22, %v778_v37  ;;  %v785_v47 = vmin.f32 %v1780_v23, %v778_v37  ;;  %v786_v48 = vmin.f32 %v1782_v24, %v778_v37  ;;  %v788_v49 = vmul.f32 %v787_v38, %v779_v41 }
  0xe3   : > { %v789_v50 = vmul.f32 %v787_v38, %v780_v42  ;;  %v790_v51 = vmul.f32 %v787_v38, %v781_v43  ;;  %v791_v52 = vmul.f32 %v787_v38, %v782_v44  ;;  %v792_v53 = vmul.f32 %v787_v38, %v783_v45 }
  0xe4   : > { %v793_v54 = vmul.f32 %v787_v38, %v784_v46  ;;  %v794_v55 = vmul.f32 %v787_v38, %v785_v47  ;;  %v795_v56 = vmul.f32 %v787_v38, %v786_v48  ;;  %v796_v57 = vadd.f32 %v788_v49, %v768_v29 }
  0xe5   : > { %v797_v58 = vadd.f32 %v789_v50, %v769_v30  ;;  %v798_v59 = vadd.f32 %v790_v51, %v770_v31  ;;  %v799_v60 = vadd.f32 %v791_v52, %v771_v32  ;;  %v800_v61 = vadd.f32 %v792_v53, %v772_v33 }
  0xe6   : > { %v801_v62 = vadd.f32 %v793_v54, %v773_v34  ;;  %v802_v63 = vadd.f32 %v794_v55, %v774_v35  ;;  %v803_v0 = vadd.f32 %v795_v56, %v775_v36  ;;  %v807_v1 = vmin.f32 %v1768_v17, %v806_v39 }
  0xe7   : > { %v808_v2 = vmin.f32 %v1770_v18, %v806_v39  ;;  %v809_v3 = vmin.f32 %v1772_v19, %v806_v39  ;;  %v810_v4 = vmin.f32 %v1774_v20, %v806_v39  ;;  %v811_v5 = vmin.f32 %v1776_v21, %v806_v39 }
  0xe8   : > { %v812_v6 = vmin.f32 %v1778_v22, %v806_v39  ;;  %v813_v7 = vmin.f32 %v1780_v23, %v806_v39  ;;  %v814_v8 = vmin.f32 %v1782_v24, %v806_v39  ;;  %v816_v9 = vmul.f32 %v815_v40, %v807_v1 }
  0xe9   : > { %v817_v10 = vmul.f32 %v815_v40, %v808_v2  ;;  %v818_v11 = vmul.f32 %v815_v40, %v809_v3  ;;  %v819_v12 = vmul.f32 %v815_v40, %v810_v4  ;;  %v820_v13 = vmul.f32 %v815_v40, %v811_v5 }
  0xea   : > { %v821_v14 = vmul.f32 %v815_v40, %v812_v6  ;;  %v822_v15 = vmul.f32 %v815_v40, %v813_v7  ;;  %v823_v16 = vmul.f32 %v815_v40, %v814_v8  ;;  %v824_v25 = vadd.f32 %v816_v9, %v796_v57 }
  0xeb   : > { %v825_v26 = vadd.f32 %v817_v10, %v797_v58  ;;  %v826_v27 = vadd.f32 %v818_v11, %v798_v59  ;;  %v827_v28 = vadd.f32 %v819_v12, %v799_v60  ;;  %v828_v29 = vadd.f32 %v820_v13, %v800_v61 }
  0xec   : > { %v829_v30 = vadd.f32 %v821_v14, %v801_v62  ;;  %v830_v31 = vadd.f32 %v822_v15, %v802_v63  ;;  %v831_v32 = vadd.f32 %v823_v16, %v803_v0  ;;  %v834_v33 = vstv %s2047_s24  ;;  %s2159_s24 = sld [smem:[#allocation3 + $0x1c]] }
  0xed   : > { %v843_v34 = vstv %s2045_s23  ;;  %v862_v35 = vstv %s2051_s5  ;;  %v871_v36 = vstv %s2049_s26  ;;  %v835_v37 = vmin.f32 %v1768_v17, %v834_v33  ;;  %s2157_s23 = sld [smem:[#allocation7 + $0x1c]]  ;;  %s2161_s26 = sld [smem:[#allocation7 + $0x1d]] }
  0xee   : > { %v836_v38 = vmin.f32 %v1770_v18, %v834_v33  ;;  %v837_v39 = vmin.f32 %v1772_v19, %v834_v33  ;;  %v838_v40 = vmin.f32 %v1774_v20, %v834_v33  ;;  %v839_v41 = vmin.f32 %v1776_v21, %v834_v33  ;;  %s2163_s5 = sld [smem:[#allocation3 + $0x1d]] }
  0xef   : > { %v840_v42 = vmin.f32 %v1778_v22, %v834_v33  ;;  %v841_v43 = vmin.f32 %v1780_v23, %v834_v33  ;;  %v842_v44 = vmin.f32 %v1782_v24, %v834_v33  ;;  %v844_v45 = vmul.f32 %v843_v34, %v835_v37 }
  0xf0   : > { %v845_v46 = vmul.f32 %v843_v34, %v836_v38  ;;  %v846_v47 = vmul.f32 %v843_v34, %v837_v39  ;;  %v847_v48 = vmul.f32 %v843_v34, %v838_v40  ;;  %v848_v49 = vmul.f32 %v843_v34, %v839_v41 }
  0xf1   : > { %v849_v50 = vmul.f32 %v843_v34, %v840_v42  ;;  %v850_v51 = vmul.f32 %v843_v34, %v841_v43  ;;  %v851_v52 = vmul.f32 %v843_v34, %v842_v44  ;;  %v852_v53 = vadd.f32 %v844_v45, %v824_v25 }
  0xf2   : > { %v853_v54 = vadd.f32 %v845_v46, %v825_v26  ;;  %v854_v55 = vadd.f32 %v846_v47, %v826_v27  ;;  %v855_v56 = vadd.f32 %v847_v48, %v827_v28  ;;  %v856_v57 = vadd.f32 %v848_v49, %v828_v29 }
  0xf3   : > { %v857_v58 = vadd.f32 %v849_v50, %v829_v30  ;;  %v858_v59 = vadd.f32 %v850_v51, %v830_v31  ;;  %v859_v60 = vadd.f32 %v851_v52, %v831_v32  ;;  %v863_v61 = vmin.f32 %v1768_v17, %v862_v35 }
  0xf4   : > { %v864_v62 = vmin.f32 %v1770_v18, %v862_v35  ;;  %v865_v63 = vmin.f32 %v1772_v19, %v862_v35  ;;  %v866_v0 = vmin.f32 %v1774_v20, %v862_v35  ;;  %v867_v1 = vmin.f32 %v1776_v21, %v862_v35 }
  0xf5   : > { %v868_v2 = vmin.f32 %v1778_v22, %v862_v35  ;;  %v869_v3 = vmin.f32 %v1780_v23, %v862_v35  ;;  %v870_v4 = vmin.f32 %v1782_v24, %v862_v35  ;;  %v872_v5 = vmul.f32 %v871_v36, %v863_v61 }
  0xf6   : > { %v873_v6 = vmul.f32 %v871_v36, %v864_v62  ;;  %v874_v7 = vmul.f32 %v871_v36, %v865_v63  ;;  %v875_v8 = vmul.f32 %v871_v36, %v866_v0  ;;  %v876_v9 = vmul.f32 %v871_v36, %v867_v1 }
  0xf7   : > { %v877_v10 = vmul.f32 %v871_v36, %v868_v2  ;;  %v878_v11 = vmul.f32 %v871_v36, %v869_v3  ;;  %v879_v12 = vmul.f32 %v871_v36, %v870_v4  ;;  %v880_v13 = vadd.f32 %v872_v5, %v852_v53 }
  0xf8   : > { %v881_v14 = vadd.f32 %v873_v6, %v853_v54  ;;  %v882_v15 = vadd.f32 %v874_v7, %v854_v55  ;;  %v883_v16 = vadd.f32 %v875_v8, %v855_v56  ;;  %v884_v25 = vadd.f32 %v876_v9, %v856_v57 }
  0xf9   : > { %v885_v26 = vadd.f32 %v877_v10, %v857_v58  ;;  %v886_v27 = vadd.f32 %v878_v11, %v858_v59  ;;  %v887_v28 = vadd.f32 %v879_v12, %v859_v60  ;;  %v890_v29 = vstv %s2075_s12  ;;  %s2187_s12 = sld [smem:[#allocation3 + $0x1e]] }
  0xfa   : > { %v899_v30 = vstv %s2073_s7  ;;  %v918_v31 = vstv %s2079_s9  ;;  %v927_v32 = vstv %s2077_s6  ;;  %v891_v33 = vmin.f32 %v1768_v17, %v890_v29  ;;  %s2185_s7 = sld [smem:[#allocation7 + $0x1e]]  ;;  %s2189_s6 = sld [smem:[#allocation7 + $0x1f]] }
  0xfb   : > { %v892_v34 = vmin.f32 %v1770_v18, %v890_v29  ;;  %v893_v35 = vmin.f32 %v1772_v19, %v890_v29  ;;  %v894_v36 = vmin.f32 %v1774_v20, %v890_v29  ;;  %v895_v37 = vmin.f32 %v1776_v21, %v890_v29  ;;  %s2191_s9 = sld [smem:[#allocation3 + $0x1f]] }
  0xfc   : > { %v896_v38 = vmin.f32 %v1778_v22, %v890_v29  ;;  %v897_v39 = vmin.f32 %v1780_v23, %v890_v29  ;;  %v898_v40 = vmin.f32 %v1782_v24, %v890_v29  ;;  %v900_v41 = vmul.f32 %v899_v30, %v891_v33 }
  0xfd   : > { %v901_v42 = vmul.f32 %v899_v30, %v892_v34  ;;  %v902_v43 = vmul.f32 %v899_v30, %v893_v35  ;;  %v903_v44 = vmul.f32 %v899_v30, %v894_v36  ;;  %v904_v45 = vmul.f32 %v899_v30, %v895_v37 }
  0xfe   : > { %v905_v46 = vmul.f32 %v899_v30, %v896_v38  ;;  %v906_v47 = vmul.f32 %v899_v30, %v897_v39  ;;  %v907_v48 = vmul.f32 %v899_v30, %v898_v40  ;;  %v908_v49 = vadd.f32 %v900_v41, %v880_v13 }
  0xff   : > { %v909_v50 = vadd.f32 %v901_v42, %v881_v14  ;;  %v910_v51 = vadd.f32 %v902_v43, %v882_v15  ;;  %v911_v52 = vadd.f32 %v903_v44, %v883_v16  ;;  %v912_v53 = vadd.f32 %v904_v45, %v884_v25 }
 0x100   : > { %v913_v54 = vadd.f32 %v905_v46, %v885_v26  ;;  %v914_v55 = vadd.f32 %v906_v47, %v886_v27  ;;  %v915_v56 = vadd.f32 %v907_v48, %v887_v28  ;;  %v919_v57 = vmin.f32 %v1768_v17, %v918_v31 }
 0x101   : > { %v920_v58 = vmin.f32 %v1770_v18, %v918_v31  ;;  %v921_v59 = vmin.f32 %v1772_v19, %v918_v31  ;;  %v922_v60 = vmin.f32 %v1774_v20, %v918_v31  ;;  %v923_v61 = vmin.f32 %v1776_v21, %v918_v31 }
 0x102   : > { %v924_v62 = vmin.f32 %v1778_v22, %v918_v31  ;;  %v925_v63 = vmin.f32 %v1780_v23, %v918_v31  ;;  %v926_v0 = vmin.f32 %v1782_v24, %v918_v31  ;;  %v928_v1 = vmul.f32 %v927_v32, %v919_v57 }
 0x103   : > { %v929_v2 = vmul.f32 %v927_v32, %v920_v58  ;;  %v930_v3 = vmul.f32 %v927_v32, %v921_v59  ;;  %v931_v4 = vmul.f32 %v927_v32, %v922_v60  ;;  %v932_v5 = vmul.f32 %v927_v32, %v923_v61 }
 0x104   : > { %v933_v6 = vmul.f32 %v927_v32, %v924_v62  ;;  %v934_v7 = vmul.f32 %v927_v32, %v925_v63  ;;  %v935_v8 = vmul.f32 %v927_v32, %v926_v0  ;;  %v936_v9 = vadd.f32 %v928_v1, %v908_v49 }
 0x105   : > { %v937_v10 = vadd.f32 %v929_v2, %v909_v50  ;;  %v938_v11 = vadd.f32 %v930_v3, %v910_v51  ;;  %v939_v12 = vadd.f32 %v931_v4, %v911_v52  ;;  %v940_v13 = vadd.f32 %v932_v5, %v912_v53 }
 0x106   : > { %v941_v14 = vadd.f32 %v933_v6, %v913_v54  ;;  %v942_v15 = vadd.f32 %v934_v7, %v914_v55  ;;  %v943_v16 = vadd.f32 %v935_v8, %v915_v56  ;;  %v946_v25 = vstv %s2103_s11  ;;  %s243_s11 = scalar_lea.vmem [#allocation10], %s1296_s30  ;;  %s1177_s30 = scalar_lea.sflag [#allocation5], %s1756_s10 }
 0x107   : > { %v955_v26 = vstv %s2101_s8  ;;  %v974_v27 = vstv %s2107_s14  ;;  %v983_v28 = vstv %s2105_s13  ;;  %v947_v29 = vmin.f32 %v1768_v17, %v946_v25  ;;  %s1366_s8 = sshll.u32 %s1631_s0, 10  ;;  %s1190_s13 = sshll.u32 %s243_s11, 4  ;;  %s2229_s13 = int_to_ptr.vmem [resolvable:$true] %s1190_s13 }
 0x108   : > { %v948_v30 = vmin.f32 %v1770_v18, %v946_v25  ;;  %v949_v31 = vmin.f32 %v1772_v19, %v946_v25  ;;  %v950_v32 = vmin.f32 %v1774_v20, %v946_v25  ;;  %v951_v33 = vmin.f32 %v1776_v21, %v946_v25  ;;  %s2227_s0 = scalar_lea.hbm %s2277_s4, %s1366_s8 }
 0x109   : > { %v952_v34 = vmin.f32 %v1778_v22, %v946_v25  ;;  %v953_v35 = vmin.f32 %v1780_v23, %v946_v25  ;;  %v954_v36 = vmin.f32 %v1782_v24, %v946_v25  ;;  %v956_v37 = vmul.f32 %v955_v26, %v947_v29 }
 0x10a   : > { %v957_v38 = vmul.f32 %v955_v26, %v948_v30  ;;  %v958_v39 = vmul.f32 %v955_v26, %v949_v31  ;;  %v959_v40 = vmul.f32 %v955_v26, %v950_v32  ;;  %v960_v41 = vmul.f32 %v955_v26, %v951_v33 }
 0x10b   : > { %v961_v42 = vmul.f32 %v955_v26, %v952_v34  ;;  %v962_v43 = vmul.f32 %v955_v26, %v953_v35  ;;  %v963_v44 = vmul.f32 %v955_v26, %v954_v36  ;;  %v964_v45 = vadd.f32 %v956_v37, %v936_v9 }
 0x10c   : > { %v965_v46 = vadd.f32 %v957_v38, %v937_v10  ;;  %v966_v47 = vadd.f32 %v958_v39, %v938_v11  ;;  %v967_v48 = vadd.f32 %v959_v40, %v939_v12  ;;  %v968_v49 = vadd.f32 %v960_v41, %v940_v13 }
 0x10d   : > { %v969_v50 = vadd.f32 %v961_v42, %v941_v14  ;;  %v970_v51 = vadd.f32 %v962_v43, %v942_v15  ;;  %v971_v52 = vadd.f32 %v963_v44, %v943_v16  ;;  %v975_v53 = vmin.f32 %v1768_v17, %v974_v27 }
 0x10e   : > { %v976_v54 = vmin.f32 %v1770_v18, %v974_v27  ;;  %v977_v55 = vmin.f32 %v1772_v19, %v974_v27  ;;  %v978_v56 = vmin.f32 %v1774_v20, %v974_v27  ;;  %v979_v57 = vmin.f32 %v1776_v21, %v974_v27 }
 0x10f   : > { %v980_v58 = vmin.f32 %v1778_v22, %v974_v27  ;;  %v981_v59 = vmin.f32 %v1780_v23, %v974_v27  ;;  %v982_v60 = vmin.f32 %v1782_v24, %v974_v27  ;;  %v984_v61 = vmul.f32 %v983_v28, %v975_v53 }
 0x110   : > { %v985_v62 = vmul.f32 %v983_v28, %v976_v54  ;;  %v986_v63 = vmul.f32 %v983_v28, %v977_v55  ;;  %v987_v0 = vmul.f32 %v983_v28, %v978_v56  ;;  %v988_v1 = vmul.f32 %v983_v28, %v979_v57 }
 0x111   : > { %v989_v2 = vmul.f32 %v983_v28, %v980_v58  ;;  %v990_v3 = vmul.f32 %v983_v28, %v981_v59  ;;  %v991_v4 = vmul.f32 %v983_v28, %v982_v60  ;;  %v992_v5 = vadd.f32 %v984_v61, %v964_v45 }
 0x112   : > { %v993_v6 = vadd.f32 %v985_v62, %v965_v46  ;;  %v994_v7 = vadd.f32 %v986_v63, %v966_v47  ;;  %v995_v8 = vadd.f32 %v987_v0, %v967_v48  ;;  %v996_v9 = vadd.f32 %v988_v1, %v968_v49 }
 0x113   : > { %v997_v10 = vadd.f32 %v989_v2, %v969_v50  ;;  %v998_v11 = vadd.f32 %v990_v3, %v970_v51  ;;  %v999_v12 = vadd.f32 %v991_v4, %v971_v52  ;;  %v1002_v13 = vstv %s2131_s16  ;;  %s1498_s16 = scalar_lea.vmem %s2229_s13, 1024 }
 0x114   : > { %v1011_v14 = vstv %s2129_s27  ;;  %v1030_v15 = vstv %s2135_s15  ;;  %v1039_v16 = vstv %s2133_s21  ;;  %v1003_v25 = vmin.f32 %v1768_v17, %v1002_v13  ;;  %p1499_p5 = scmp.ne.s32.totalorder %s2229_s13, %s1498_s16  ;;  %s1579_s21 = smov [#allocation10]  }
 0x115   : > { %v1004_v26 = vmin.f32 %v1770_v18, %v1002_v13  ;;  %v1005_v27 = vmin.f32 %v1772_v19, %v1002_v13  ;;  %v1006_v28 = vmin.f32 %v1774_v20, %v1002_v13  ;;  %v1007_v29 = vmin.f32 %v1776_v21, %v1002_v13  ;;  %s1502_s15 = sshll.u32 %s1579_s21, 4  ;;  %s1503_s15 = int_to_ptr.vmem [resolvable:$false] %s1502_s15 }
 0x116   : > { %v1008_v30 = vmin.f32 %v1778_v22, %v1002_v13  ;;  %v1009_v31 = vmin.f32 %v1780_v23, %v1002_v13  ;;  %v1010_v32 = vmin.f32 %v1782_v24, %v1002_v13  ;;  %v1012_v33 = vmul.f32 %v1011_v14, %v1003_v25  ;;  %p1500_p8 = pnand %p1499_p5, %p2297_p2  ;;  %p1505_p4 = scmp.lt.s32.totalorder %s2229_s13, %s1503_s15 }
 0x117   : > { %v1013_v34 = vmul.f32 %v1011_v14, %v1004_v26  ;;  %v1014_v35 = vmul.f32 %v1011_v14, %v1005_v27  ;;  %v1015_v36 = vmul.f32 %v1011_v14, %v1006_v28  ;;  %v1016_v37 = vmul.f32 %v1011_v14, %v1007_v29 }
 0x118   : > { %v1017_v38 = vmul.f32 %v1011_v14, %v1008_v30  ;;  %v1018_v39 = vmul.f32 %v1011_v14, %v1009_v31  ;;  %v1019_v40 = vmul.f32 %v1011_v14, %v1010_v32  ;;  %v1020_v41 = vadd.f32 %v1012_v33, %v992_v5  ;;  %p1501_p10 = pneg %p1500_p8 }
 0x119   : > { %v1021_v42 = vadd.f32 %v1013_v34, %v993_v6  ;;  %v1022_v43 = vadd.f32 %v1014_v35, %v994_v7  ;;  %v1023_v44 = vadd.f32 %v1015_v36, %v995_v8  ;;  %v1024_v45 = vadd.f32 %v1016_v37, %v996_v9 }
 0x11a   : > { %v1025_v46 = vadd.f32 %v1017_v38, %v997_v10  ;;  %v1026_v47 = vadd.f32 %v1018_v39, %v998_v11  ;;  %v1027_v48 = vadd.f32 %v1019_v40, %v999_v12  ;;  %v1031_v49 = vmin.f32 %v1768_v17, %v1030_v15 }
 0x11b   : > { %v1032_v50 = vmin.f32 %v1770_v18, %v1030_v15  ;;  %v1033_v51 = vmin.f32 %v1772_v19, %v1030_v15  ;;  %v1034_v52 = vmin.f32 %v1774_v20, %v1030_v15  ;;  %v1035_v53 = vmin.f32 %v1776_v21, %v1030_v15 }
 0x11c   : > { %v1036_v54 = vmin.f32 %v1778_v22, %v1030_v15  ;;  %v1037_v55 = vmin.f32 %v1780_v23, %v1030_v15  ;;  %v1038_v56 = vmin.f32 %v1782_v24, %v1030_v15  ;;  %v1040_v57 = vmul.f32 %v1039_v16, %v1031_v49 }
 0x11d   : > { %v1041_v58 = vmul.f32 %v1039_v16, %v1032_v50  ;;  %v1042_v59 = vmul.f32 %v1039_v16, %v1033_v51  ;;  %v1043_v60 = vmul.f32 %v1039_v16, %v1034_v52  ;;  %v1044_v61 = vmul.f32 %v1039_v16, %v1035_v53 }
 0x11e   : > { %v1045_v62 = vmul.f32 %v1039_v16, %v1036_v54  ;;  %v1046_v63 = vmul.f32 %v1039_v16, %v1037_v55  ;;  %v1047_v0 = vmul.f32 %v1039_v16, %v1038_v56  ;;  %v1048_v1 = vadd.f32 %v1040_v57, %v1020_v41 }
 0x11f   : > { %v1049_v2 = vadd.f32 %v1041_v58, %v1021_v42  ;;  %v1050_v3 = vadd.f32 %v1042_v59, %v1022_v43  ;;  %v1051_v4 = vadd.f32 %v1043_v60, %v1023_v44  ;;  %v1052_v5 = vadd.f32 %v1044_v61, %v1024_v45 }
 0x120   : > { %v1053_v6 = vadd.f32 %v1045_v62, %v1025_v46  ;;  %v1054_v7 = vadd.f32 %v1046_v63, %v1026_v47  ;;  %v1055_v8 = vadd.f32 %v1047_v0, %v1027_v48  ;;  %v1058_v9 = vstv %s2159_s24 }
 0x121   : > { %v1067_v10 = vstv %s2157_s23  ;;  %v1086_v11 = vstv %s2163_s5  ;;  %v1095_v12 = vstv %s2161_s26  ;;  %v1059_v13 = vmin.f32 %v1768_v17, %v1058_v9  ;;  %s1504_s23 = scalar_lea.vmem %s1503_s15, 2048 }
 0x122   : > { %v1060_v14 = vmin.f32 %v1770_v18, %v1058_v9  ;;  %v1061_v15 = vmin.f32 %v1772_v19, %v1058_v9  ;;  %v1062_v16 = vmin.f32 %v1774_v20, %v1058_v9  ;;  %v1063_v25 = vmin.f32 %v1776_v21, %v1058_v9  ;;  %p1506_p12 = scmp.lt.s32.totalorder %s1504_s23, %s1498_s16 }
 0x123   : > { %v1064_v26 = vmin.f32 %v1778_v22, %v1058_v9  ;;  %v1065_v27 = vmin.f32 %v1780_v23, %v1058_v9  ;;  %v1066_v28 = vmin.f32 %v1782_v24, %v1058_v9  ;;  %v1068_v29 = vmul.f32 %v1067_v10, %v1059_v13 }
 0x124   : > { %v1069_v30 = vmul.f32 %v1067_v10, %v1060_v14  ;;  %v1070_v31 = vmul.f32 %v1067_v10, %v1061_v15  ;;  %v1071_v32 = vmul.f32 %v1067_v10, %v1062_v16  ;;  %v1072_v33 = vmul.f32 %v1067_v10, %v1063_v25  ;;  %p1507_p0 = por %p1506_p12, %p1505_p4 }
 0x125   : > { %v1073_v34 = vmul.f32 %v1067_v10, %v1064_v26  ;;  %v1074_v35 = vmul.f32 %v1067_v10, %v1065_v27  ;;  %v1075_v36 = vmul.f32 %v1067_v10, %v1066_v28  ;;  %v1076_v37 = vadd.f32 %v1068_v29, %v1048_v1 }
 0x126   : > { %v1077_v38 = vadd.f32 %v1069_v30, %v1049_v2  ;;  %v1078_v39 = vadd.f32 %v1070_v31, %v1050_v3  ;;  %v1079_v40 = vadd.f32 %v1071_v32, %v1051_v4  ;;  %v1080_v41 = vadd.f32 %v1072_v33, %v1052_v5  ;;  %p1508_p7 = pnand %p1507_p0, %p1501_p10 }
 0x127   : > { %v1081_v42 = vadd.f32 %v1073_v34, %v1053_v6  ;;  %v1082_v43 = vadd.f32 %v1074_v35, %v1054_v7  ;;  %v1083_v44 = vadd.f32 %v1075_v36, %v1055_v8  ;;  %v1087_v45 = vmin.f32 %v1768_v17, %v1086_v11 }
 0x128   : > { %v1088_v46 = vmin.f32 %v1770_v18, %v1086_v11  ;;  %v1089_v47 = vmin.f32 %v1772_v19, %v1086_v11  ;;  %v1090_v48 = vmin.f32 %v1774_v20, %v1086_v11  ;;  %v1091_v49 = vmin.f32 %v1776_v21, %v1086_v11 }
 0x129   : > { %v1092_v50 = vmin.f32 %v1778_v22, %v1086_v11  ;;  %v1093_v51 = vmin.f32 %v1780_v23, %v1086_v11  ;;  %v1094_v52 = vmin.f32 %v1782_v24, %v1086_v11  ;;  %v1096_v53 = vmul.f32 %v1095_v12, %v1087_v45 }
 0x12a   : > { %v1097_v54 = vmul.f32 %v1095_v12, %v1088_v46  ;;  %v1098_v55 = vmul.f32 %v1095_v12, %v1089_v47  ;;  %v1099_v56 = vmul.f32 %v1095_v12, %v1090_v48  ;;  %v1100_v57 = vmul.f32 %v1095_v12, %v1091_v49 }
 0x12b   : > { %v1101_v58 = vmul.f32 %v1095_v12, %v1092_v50  ;;  %v1102_v59 = vmul.f32 %v1095_v12, %v1093_v51  ;;  %v1103_v60 = vmul.f32 %v1095_v12, %v1094_v52  ;;  %v1104_v61 = vadd.f32 %v1096_v53, %v1076_v37 }
 0x12c   : > { %v1105_v62 = vadd.f32 %v1097_v54, %v1077_v38  ;;  %v1106_v63 = vadd.f32 %v1098_v55, %v1078_v39  ;;  %v1107_v0 = vadd.f32 %v1099_v56, %v1079_v40  ;;  %v1108_v1 = vadd.f32 %v1100_v57, %v1080_v41 }
 0x12d   : > { %v1109_v2 = vadd.f32 %v1101_v58, %v1081_v42  ;;  %v1110_v3 = vadd.f32 %v1102_v59, %v1082_v43  ;;  %v1111_v4 = vadd.f32 %v1103_v60, %v1083_v44  ;;  %v1114_v5 = vstv %s2187_s12 }
 0x12e   : > { %v1123_v6 = vstv %s2185_s7  ;;  %v1142_v7 = vstv %s2191_s9  ;;  %v1151_v8 = vstv %s2189_s6  ;;  %v1115_v9 = vmin.f32 %v1768_v17, %v1114_v5 }
 0x12f   : > { %v1116_v10 = vmin.f32 %v1770_v18, %v1114_v5  ;;  %v1117_v11 = vmin.f32 %v1772_v19, %v1114_v5  ;;  %v1118_v12 = vmin.f32 %v1774_v20, %v1114_v5  ;;  %v1119_v13 = vmin.f32 %v1776_v21, %v1114_v5 }
 0x130   : > { %v1120_v14 = vmin.f32 %v1778_v22, %v1114_v5  ;;  %v1121_v15 = vmin.f32 %v1780_v23, %v1114_v5  ;;  %v1122_v16 = vmin.f32 %v1782_v24, %v1114_v5  ;;  %v1124_v25 = vmul.f32 %v1123_v6, %v1115_v9 }
 0x131   : > { %v1125_v26 = vmul.f32 %v1123_v6, %v1116_v10  ;;  %v1126_v27 = vmul.f32 %v1123_v6, %v1117_v11  ;;  %v1127_v28 = vmul.f32 %v1123_v6, %v1118_v12  ;;  %v1128_v29 = vmul.f32 %v1123_v6, %v1119_v13 }
 0x132   : > { %v1129_v30 = vmul.f32 %v1123_v6, %v1120_v14  ;;  %v1130_v31 = vmul.f32 %v1123_v6, %v1121_v15  ;;  %v1131_v32 = vmul.f32 %v1123_v6, %v1122_v16  ;;  %v1132_v33 = vadd.f32 %v1124_v25, %v1104_v61 }
 0x133   : > { %v1133_v34 = vadd.f32 %v1125_v26, %v1105_v62  ;;  %v1134_v35 = vadd.f32 %v1126_v27, %v1106_v63  ;;  %v1135_v36 = vadd.f32 %v1127_v28, %v1107_v0  ;;  %v1136_v37 = vadd.f32 %v1128_v29, %v1108_v1 }
 0x134   : > { %v1137_v38 = vadd.f32 %v1129_v30, %v1109_v2  ;;  %v1138_v39 = vadd.f32 %v1130_v31, %v1110_v3  ;;  %v1139_v40 = vadd.f32 %v1131_v32, %v1111_v4  ;;  %v1143_v41 = vmin.f32 %v1768_v17, %v1142_v7 }
 0x135   : > { %v1144_v42 = vmin.f32 %v1770_v18, %v1142_v7  ;;  %v1145_v43 = vmin.f32 %v1772_v19, %v1142_v7  ;;  %v1146_v44 = vmin.f32 %v1774_v20, %v1142_v7  ;;  %v1147_v45 = vmin.f32 %v1776_v21, %v1142_v7 }
 0x136   : > { %v1148_v46 = vmin.f32 %v1778_v22, %v1142_v7  ;;  %v1149_v47 = vmin.f32 %v1780_v23, %v1142_v7  ;;  %v1150_v48 = vmin.f32 %v1782_v24, %v1142_v7  ;;  %v1152_v49 = vmul.f32 %v1151_v8, %v1143_v41 }
 0x137   : > { %v1153_v17 = vmul.f32 %v1151_v8, %v1144_v42  ;;  %v1154_v50 = vmul.f32 %v1151_v8, %v1145_v43  ;;  %v1155_v18 = vmul.f32 %v1151_v8, %v1146_v44  ;;  %v1156_v51 = vmul.f32 %v1151_v8, %v1147_v45 }
 0x138   : > { %v1157_v19 = vmul.f32 %v1151_v8, %v1148_v46  ;;  %v1158_v52 = vmul.f32 %v1151_v8, %v1149_v47  ;;  %v1159_v20 = vmul.f32 %v1151_v8, %v1150_v48  ;;  %v1160_v53 = vadd.f32 %v1152_v49, %v1132_v33 }
 0x139   : > { %v1161_v21 = vadd.f32 %v1153_v17, %v1133_v34  ;;  %v1162_v54 = vadd.f32 %v1154_v50, %v1134_v35  ;;  %v1163_v22 = vadd.f32 %v1155_v18, %v1135_v36  ;;  %v1164_v23 = vadd.f32 %v1156_v51, %v1136_v37 }
 0x13a   : > { %v1165_v24 = vadd.f32 %v1157_v19, %v1137_v38  ;;  %v1166_v55 = vadd.f32 %v1158_v52, %v1138_v39  ;;  %v1167_v56 = vadd.f32 %v1159_v20, %v1139_v40  ;;  %1168 = vst [vmem:[%s243_s11] sm:$0xff] %v1160_v53 }
 0x13b   : > { %1169 = vst [vmem:[%s243_s11 + $0x8] sm:$0xff] %v1161_v21  ;;  %1170 = vst [vmem:[%s243_s11 + $0x10] sm:$0xff] %v1162_v54 }
 0x13c   : > { %1171 = vst [vmem:[%s243_s11 + $0x18] sm:$0xff] %v1163_v22  ;;  %1172 = vst [vmem:[%s243_s11 + $0x20] sm:$0xff] %v1164_v23 }
 0x13d   : > { %1173 = vst [vmem:[%s243_s11 + $0x28] sm:$0xff] %v1165_v24  ;;  %1174 = vst [vmem:[%s243_s11 + $0x30] sm:$0xff] %v1166_v55 }
 0x13e   : > { %1175 = vst [vmem:[%s243_s11 + $0x38] sm:$0xff] %v1167_v56 }
 0x13f   : > { %1511 = shalt.err (!%p1508_p7)
}
 0x140   : > { %s1512_s24 = scalar_lea.hbm %s2227_s0, 1024  ;;  %s1516_s7 = scalar_lea.hbm %s2277_s4, 2048 }
 0x141   : > { %p1513_p11 = scmp.ne.s32.totalorder %s2227_s0, %s1512_s24  ;;  %p1517_p9 = scmp.lt.u32.totalorder %s2227_s0, %s2277_s4 }
 0x142   : > { %p1518_p1 = scmp.lt.u32.totalorder %s1516_s7, %s1512_s24  ;;  %p1520_p5 = scmp.lt.u32.totalorder %s1512_s24, %s2227_s0 }
 0x143   : > { %p1514_p13 = pnand %p1513_p11, %p2297_p2 }
 0x144   : > { %p1519_p6 = por %p1518_p1, %p1517_p9 }
 0x145   : > { %p1515_p3 = pneg %p1514_p13 }
 0x146   : > { %p1521_p8 = por %p1520_p5, %p1519_p6 }
 0x148   : > { %p1522_p10 = pnand %p1521_p8, %p1515_p3 }
 0x14a   : > { %1525 = shalt.err (!%p1522_p10)
}
 0x14b   : > { %s1580_s9 = smov 128   ;;  %s1581_s8 = smov 8  }
 0x14c   : > { %1377 = dma.vmem_to_hbm [thread:$0]  (%p2297_p2), %s2229_s13, 1024, %s2227_s0, %s1177_s30, %s1580_s9, %s1580_s9, %s1581_s8  }
 0x14d PF: > { %s1205_s11 = sand.u32 1, %s1560_s17   ;;  %p2298_p4 = scmp.ne.s32.totalorder %s2286_s29, 0 }
 0x14e   : > { %p2299_p12 = scmp.ge.s32.totalorder %s1572_s20, 2  ;;  %s1206_s14 = scalar_lea.sflag [#allocation5], %s1205_s11 }
 0x150   : > { %p1391_p0 = pnand %p2299_p12, %p2298_p4 }
 0x152   : > { %1555 = dma.done.wait (!%p1391_p0), %s1206_s14, 1024  }
 0x153   : > { %1557 = vsyncadd (!%p1391_p0), %s1206_s14, 4294966272  ;;  %p20_p7 = scmp.ge.s32.totalorder %s1635_s22, 4   ;;  %s2300_s17 = smov %s1564_s18 }
 0x154   : > { %s2301_s18 = smov %s1568_s19  ;;  %s2302_s19 = smov %s1647_s25 }
 0x155   : > { %s2303_s20 = smov %s1635_s22  ;;  %22 = sbr.rel (!%p20_p7) target bundleno = 9 (0x9), region = 90 }
 0x15c   :  { %1211 = vsyncpa [#allocation4], 1 }
 0x15d   :  { %1213 = vsyncpa [#allocation4 + $0x1], 1 }
 0x15e   :  { %1214 = vsyncpa [#allocation5], 1 }
 0x15f   :  { %1216 = vsyncpa [#allocation5 + $0x1], 1 }
 0x160   :  { %1217 = vsyncpa [#allocation6], 1 }
 0x161   :  { %1219 = vsyncpa [#allocation6 + $0x1], 1 }
 0x162   :  { %1220 = vsyncpa [#allocation8], 1 }

</bundles_post_ra>
